<compile_context>
chip_gen: v7x
topology: tpu7x:2x2x1
jax: 0.10.0
libtpu: 0.0.40
codegen_flags: <defaults>
</compile_context>

<pallas_src>
from functools import partial

import jax
import jax.numpy as jnp
from jax.experimental import pallas as pl
from jax.experimental.pallas import tpu as pltpu


# ---------------------------------------------------------------------------
# Kernel
# ---------------------------------------------------------------------------
def _gru_stack_kernel(x0_ref, w_hbm, b_ref, h_ref, hid_ref, w_buf, sem, *, H, L):
    """Whole bidirectional GRU stack (seq_len == 1, batch == 1), one invocation.

    x0_ref : (1, 2H)      f32  layer-0 input (embedding zero-padded to 2H), VMEM
    w_hbm  : (L, 4H, 8H)  bf16 block-packed fused weights, left in HBM (pl.ANY)
    b_ref  : (L, 8H)      f32  packed fused biases, VMEM
    h_ref  : (L, 2H)      f32  initial hidden per layer [h_fwd | h_bwd], VMEM
    hid_ref: (1, 2*L*H)   f32  all new hiddens, layer-major [h_fwd | h_bwd], VMEM
    w_buf  : (2, 4H, 8H)  bf16 VMEM double buffer (one layer slab per slot)
    sem    : (2,)              DMA completion semaphores
    """
    H2 = 2 * H

    def fetch(layer, slot):
        pltpu.make_async_copy(w_hbm.at[layer], w_buf.at[slot], sem.at[slot]).start()

    # Prime the pipeline: start DMA for layer 0's weights.
    fetch(0, 0)

    x_cur = x0_ref[...]                  # (1, 2H) current layer input, vreg-resident
    hs = []
    for l in range(L):                   # static unroll (L = 8) -> straight-line code
        slot = l & 1
        # Wait for this layer's weight slab, then immediately prefetch the next
        # layer's slab into the other slot so its DMA hides behind this layer's
        # MXU push + sigmoid/tanh (EUP) work.
        pltpu.make_async_copy(w_hbm.at[l], w_buf.at[slot], sem.at[slot]).wait()
        if l + 1 < L:
            fetch(l + 1, 1 - slot)

        h_l = h_ref[l:l + 1, :]                              # (1, 2H) [h_fwd | h_bwd]
        # vreg-resident fused state [x | h_fwd | h_bwd] (no VMEM round-trip).
        s = jnp.concatenate([x_cur, h_l], axis=-1)           # (1, 4H)

        # One fused MXU push per layer: (1,4H)bf16 @ (4H,8H)bf16 -> (1,8H)f32
        # output column blocks: [r_f|r_b | z_f|z_b | ni_f|ni_b | nh_f|nh_b]
        g = jnp.dot(s.astype(jnp.bfloat16), w_buf[slot],
                    preferred_element_type=jnp.float32) + b_ref[l:l + 1, :]

        r = jax.nn.sigmoid(g[:, 0:H2])                       # [r_f | r_b]  (gi+gh pre-summed)
        z = jax.nn.sigmoid(g[:, H2:2 * H2])                  # [z_f | z_b]
        n = jnp.tanh(g[:, 2 * H2:3 * H2] + r * g[:, 3 * H2:4 * H2])
        hn = (1.0 - z) * n + z * h_l                         # (1, 2H) new [h_fwd | h_bwd]

        x_cur = hn                                           # next layer's input, stays in vregs
        hs.append(hn)

    # Single lane-dense (1, 2*L*H = 512) store of all layers' new hiddens.
    hid_ref[...] = jnp.concatenate(hs, axis=-1)


# ---------------------------------------------------------------------------
# Wrapper
# ---------------------------------------------------------------------------
def multilayer_bigru_forward(token, hidden, packed, *, H, L):
    H2 = 2 * H
    # Embedding lookup + view(1,1,-1)  (single-row gather kept in plain JAX glue).
    emb = packed["embedding"][token]                              # (H,)
    x0 = jnp.zeros((1, H2), jnp.float32).at[0, :H].set(emb)       # zero-pad to 2H
    h_in = hidden.reshape(L, H2)                                  # (L, 2H) [fwd | bwd] per layer

    vmem = lambda: pl.BlockSpec(memory_space=pltpu.MemorySpace.VMEM)
    kernel = partial(_gru_stack_kernel, H=H, L=L)

    hid_flat = pl.pallas_call(
        kernel,
        out_shape=jax.ShapeDtypeStruct((1, 2 * L * H), jnp.float32),
        in_specs=[vmem(),                                  # x0   : small, straight to VMEM
                  pl.BlockSpec(memory_space=pl.ANY),       # W    : stays in HBM, manual DMA
                  vmem(),                                  # b    : (L, 8H) f32
                  vmem()],                                 # h_in : (L, 2H) f32
        out_specs=vmem(),
        scratch_shapes=[pltpu.VMEM((2, 4 * H, 8 * H), jnp.bfloat16),   # weight double buffer
                        pltpu.SemaphoreType.DMA((2,))],
    )(x0, packed["W"], packed["b"], h_in)

    hidden_out = hid_flat.reshape(2 * L, 1, H)                    # (2L, 1, H): row 2l+d
    output = hid_flat[:, (L - 1) * H2:].reshape(1, 1, H2)         # last layer's [fwd | bwd]
    return output, hidden_out


# ---------------------------------------------------------------------------
# Parameter construction (PyTorch-style raw GRU params + packed kernel params)
# ---------------------------------------------------------------------------
def _pack_layer(w_ih, w_hh, b_ih, b_hh, *, H, in_dim):
    """w_ih/w_hh/b_ih/b_hh are [fwd, bwd] lists in PyTorch layout (gate order r,z,n).

    NOTE (layer-0 correctness): rows in_dim:2H of W are intentionally left zero;
    the kernel zero-pads the layer-0 embedding to 2H and relies on those zero
    rows.  Any repack (zero-trimming, gh-split) must preserve this.
    """
    H2, H4, H8 = 2 * H, 4 * H, 8 * H
    W = jnp.zeros((H4, H8), jnp.float32)

    def ih(d, gate):   # (in_dim, H)
        return w_ih[d][gate * H:(gate + 1) * H, :].T

    def hh(d, gate):   # (H, H)
        return w_hh[d][gate * H:(gate + 1) * H, :].T

    # rows: 0:2H -> x (layer-0 padded), 2H:3H -> h_fwd, 3H:4H -> h_bwd
    # cols: [r_f | r_b | z_f | z_b | ni_f | ni_b | nh_f | nh_b], each H wide
    W = W.at[:in_dim, 0 * H:1 * H].set(ih(0, 0))          # r_f  (input part)
    W = W.at[H2:3 * H, 0 * H:1 * H].set(hh(0, 0))         # r_f  (hidden part)
    W = W.at[:in_dim, 1 * H:2 * H].set(ih(1, 0))          # r_b
    W = W.at[3 * H:H4, 1 * H:2 * H].set(hh(1, 0))
    W = W.at[:in_dim, 2 * H:3 * H].set(ih(0, 1))          # z_f
    W = W.at[H2:3 * H, 2 * H:3 * H].set(hh(0, 1))
    W = W.at[:in_dim, 3 * H:4 * H].set(ih(1, 1))          # z_b
    W = W.at[3 * H:H4, 3 * H:4 * H].set(hh(1, 1))
    W = W.at[:in_dim, 4 * H:5 * H].set(ih(0, 2))          # n (input) fwd
    W = W.at[:in_dim, 5 * H:6 * H].set(ih(1, 2))          # n (input) bwd
    W = W.at[H2:3 * H, 6 * H:7 * H].set(hh(0, 2))         # n (hidden) fwd
    W = W.at[3 * H:H4, 7 * H:8 * H].set(hh(1, 2))         # n (hidden) bwd

    b = jnp.concatenate([
        b_ih[0][0:H] + b_hh[0][0:H],        # r_f
        b_ih[1][0:H] + b_hh[1][0:H],        # r_b
        b_ih[0][H:H2] + b_hh[0][H:H2],      # z_f
        b_ih[1][H:H2] + b_hh[1][H:H2],      # z_b
        b_ih[0][H2:3 * H],                  # ni_f
        b_ih[1][H2:3 * H],                  # ni_b
        b_hh[0][H2:3 * H],                  # nh_f
        b_hh[1][H2:3 * H],                  # nh_b
    ])
    return W, b


def init_params(key, vocab, H, L):
    """Deterministic synthetic parameters (PyTorch-style uniform(-1/sqrt(H), 1/sqrt(H)))."""
    k = 1.0 / jnp.sqrt(jnp.float32(H))
    keys = jax.random.split(key, 1 + L * 8)
    embedding = jax.random.normal(keys[0], (vocab, H), jnp.float32)

    raw_w_ih, raw_w_hh, raw_b_ih, raw_b_hh = [], [], [], []
    W_packed, b_packed = [], []
    idx = 1
    for l in range(L):
        in_dim = H if l == 0 else 2 * H
        lw_ih, lw_hh, lb_ih, lb_hh = [], [], [], []
        for _d in range(2):
            lw_ih.append(jax.random.uniform(keys[idx], (3 * H, in_dim), jnp.float32, -k, k)); idx += 1
            lw_hh.append(jax.random.uniform(keys[idx], (3 * H, H), jnp.float32, -k, k)); idx += 1
            lb_ih.append(jax.random.uniform(keys[idx], (3 * H,), jnp.float32, -k, k)); idx += 1
            lb_hh.append(jax.random.uniform(keys[idx], (3 * H,), jnp.float32, -k, k)); idx += 1
        raw_w_ih.append(lw_ih); raw_w_hh.append(lw_hh)
        raw_b_ih.append(lb_ih); raw_b_hh.append(lb_hh)
        Wl, bl = _pack_layer(lw_ih, lw_hh, lb_ih, lb_hh, H=H, in_dim=in_dim)
        W_packed.append(Wl); b_packed.append(bl)

    packed = dict(embedding=embedding,
                  W=jnp.stack(W_packed).astype(jnp.bfloat16),   # (L, 4H, 8H) bf16 in HBM
                  b=jnp.stack(b_packed))                        # (L, 8H) f32
    raw = dict(embedding=embedding, w_ih=raw_w_ih, w_hh=raw_w_hh,
               b_ih=raw_b_ih, b_hh=raw_b_hh)
    return packed, raw


# ---------------------------------------------------------------------------
# Pure-JAX reference (PyTorch nn.GRU layout / gate order, un-packed f32 weights)
# ---------------------------------------------------------------------------
def reference_forward(token, hidden, raw, *, H, L):
    x = raw["embedding"][token]                    # (H,)
    h_in = hidden.reshape(L, 2, H)
    hs = []
    for l in range(L):
        new = []
        for d in range(2):
            w_ih = raw["w_ih"][l][d]; w_hh = raw["w_hh"][l][d]
            b_ih = raw["b_ih"][l][d]; b_hh = raw["b_hh"][l][d]
            h = h_in[l, d]
            gi = w_ih @ x + b_ih
            gh = w_hh @ h + b_hh
            r = jax.nn.sigmoid(gi[:H] + gh[:H])
            z = jax.nn.sigmoid(gi[H:2 * H] + gh[H:2 * H])
            n = jnp.tanh(gi[2 * H:] + r * gh[2 * H:])
            new.append((1.0 - z) * n + z * h)
        hs.append(jnp.stack(new))
        x = jnp.concatenate(new)
    output = x.reshape(1, 1, 2 * H)
    hidden_out = jnp.stack(hs).reshape(2 * L, 1, H)
    return output, hidden_out


# ---------------------------------------------------------------------------
if __name__ == "__main__":
    VOCAB, H, L = 16, 32, 8   # input_size=16, hidden_size=32, num_layers=8 (module default)

    key = jax.random.PRNGKey(0)
    pkey, hkey = jax.random.split(key)
    packed, raw = init_params(pkey, VOCAB, H, L)

    token = jnp.array(3, dtype=jnp.int32)                          # scalar token index
    hidden = jax.random.normal(hkey, (2 * L, 1, H), jnp.float32)   # (2*num_layers, 1, H)

    fwd = jax.jit(partial(multilayer_bigru_forward, H=H, L=L))
    out, h_out = fwd(token, hidden, packed)
    jax.block_until_ready((out, h_out))

    ref_out, ref_h = reference_forward(token, hidden, raw, H=H, L=L)
    assert out.shape == (1, 1, 2 * H) and h_out.shape == (2 * L, 1, H)
    # Tolerance loosened vs f32 baseline: kernel stores weights / state operands
    # in bf16 (MXU-native); reference keeps f32 weights.
    assert jnp.allclose(out, ref_out, rtol=3e-2, atol=3e-2), "output mismatch"
    assert jnp.allclose(h_out, ref_h, rtol=3e-2, atol=3e-2), "hidden mismatch"

    print("KERNEL_OK")
</pallas_src>

<mosaic_0001>
module attributes {stable_mosaic.version = 11 : i64} {
  func.func @_gru_stack_kernel(%arg0: memref<1x64xf32, #tpu.memory_space<vmem>>, %arg1: memref<8x128x256xbf16, #tpu.memory_space<any>>, %arg2: memref<8x256xf32, #tpu.memory_space<vmem>>, %arg3: memref<8x64xf32, #tpu.memory_space<vmem>>, %arg4: memref<1x512xf32, #tpu.memory_space<vmem>>, %arg5: memref<2x128x256xbf16, #tpu.memory_space<vmem>>, %arg6: memref<2x!tpu.dma_semaphore, #tpu.memory_space<semaphore_mem>>) attributes {dimension_semantics = [], scalar_prefetch = 0 : i64, scratch_operands = 2 : i64, tpu.core_type = #tpu.core_type<tc>} {
    %c0_i32 = arith.constant 0 : i32
    %c0_i32_0 = arith.constant 0 : i32
    %c0_i32_1 = arith.constant 0 : i32
    %c0_i32_2 = arith.constant 0 : i32
    %c0_i32_3 = arith.constant 0 : i32
    %0 = tpu.memref_slice %arg1[%c0_i32, %c0_i32_2, %c0_i32_3] : memref<8x128x256xbf16, #tpu.memory_space<any>> -> memref<1x128x256xbf16, #tpu.memory_space<any>>
    %1 = tpu.memref_squeeze %0 : memref<1x128x256xbf16, #tpu.memory_space<any>> -> memref<128x256xbf16, #tpu.memory_space<any>>
    %c0_i32_4 = arith.constant 0 : i32
    %c0_i32_5 = arith.constant 0 : i32
    %2 = tpu.memref_slice %arg5[%c0_i32_0, %c0_i32_4, %c0_i32_5] : memref<2x128x256xbf16, #tpu.memory_space<vmem>> -> memref<1x128x256xbf16, #tpu.memory_space<vmem>>
    %3 = tpu.memref_squeeze %2 : memref<1x128x256xbf16, #tpu.memory_space<vmem>> -> memref<128x256xbf16, #tpu.memory_space<vmem>>
    %4 = tpu.memref_slice %arg6[%c0_i32_1] : memref<2x!tpu.dma_semaphore, #tpu.memory_space<semaphore_mem>> -> memref<1x!tpu.dma_semaphore, #tpu.memory_space<semaphore_mem>>
    %5 = tpu.memref_squeeze %4 : memref<1x!tpu.dma_semaphore, #tpu.memory_space<semaphore_mem>> -> memref<!tpu.dma_semaphore, #tpu.memory_space<semaphore_mem>>
    tpu.enqueue_dma source(%1 : memref<128x256xbf16, #tpu.memory_space<any>>) target(%3 : memref<128x256xbf16, #tpu.memory_space<vmem>>) target_semaphore(%5 : memref<!tpu.dma_semaphore, #tpu.memory_space<semaphore_mem>>)
    %c0 = arith.constant 0 : index
    %c0_6 = arith.constant 0 : index
    %6 = vector.load %arg0[%c0, %c0_6] : memref<1x64xf32, #tpu.memory_space<vmem>>, vector<1x64xf32>
    %c0_i32_7 = arith.constant 0 : i32
    %c0_i32_8 = arith.constant 0 : i32
    %c0_i32_9 = arith.constant 0 : i32
    %c0_i32_10 = arith.constant 0 : i32
    %c0_i32_11 = arith.constant 0 : i32
    %7 = tpu.memref_slice %arg1[%c0_i32_7, %c0_i32_10, %c0_i32_11] : memref<8x128x256xbf16, #tpu.memory_space<any>> -> memref<1x128x256xbf16, #tpu.memory_space<any>>
    %8 = tpu.memref_squeeze %7 : memref<1x128x256xbf16, #tpu.memory_space<any>> -> memref<128x256xbf16, #tpu.memory_space<any>>
    %c0_i32_12 = arith.constant 0 : i32
    %c0_i32_13 = arith.constant 0 : i32
    %9 = tpu.memref_slice %arg5[%c0_i32_8, %c0_i32_12, %c0_i32_13] : memref<2x128x256xbf16, #tpu.memory_space<vmem>> -> memref<1x128x256xbf16, #tpu.memory_space<vmem>>
    %10 = tpu.memref_squeeze %9 : memref<1x128x256xbf16, #tpu.memory_space<vmem>> -> memref<128x256xbf16, #tpu.memory_space<vmem>>
    %11 = tpu.memref_slice %arg6[%c0_i32_9] : memref<2x!tpu.dma_semaphore, #tpu.memory_space<semaphore_mem>> -> memref<1x!tpu.dma_semaphore, #tpu.memory_space<semaphore_mem>>
    %12 = tpu.memref_squeeze %11 : memref<1x!tpu.dma_semaphore, #tpu.memory_space<semaphore_mem>> -> memref<!tpu.dma_semaphore, #tpu.memory_space<semaphore_mem>>
    tpu.wait_dma2 semaphore(%12 : memref<!tpu.dma_semaphore, #tpu.memory_space<semaphore_mem>>) src(%8 : memref<128x256xbf16, #tpu.memory_space<any>>) dst(%10 : memref<128x256xbf16, #tpu.memory_space<vmem>>)
    %c1_i32 = arith.constant 1 : i32
    %c1_i32_14 = arith.constant 1 : i32
    %c1_i32_15 = arith.constant 1 : i32
    %c0_i32_16 = arith.constant 0 : i32
    %c0_i32_17 = arith.constant 0 : i32
    %13 = tpu.memref_slice %arg1[%c1_i32, %c0_i32_16, %c0_i32_17] : memref<8x128x256xbf16, #tpu.memory_space<any>> -> memref<1x128x256xbf16, #tpu.memory_space<any>>
    %14 = tpu.memref_squeeze %13 : memref<1x128x256xbf16, #tpu.memory_space<any>> -> memref<128x256xbf16, #tpu.memory_space<any>>
    %c0_i32_18 = arith.constant 0 : i32
    %c0_i32_19 = arith.constant 0 : i32
    %15 = tpu.memref_slice %arg5[%c1_i32_14, %c0_i32_18, %c0_i32_19] : memref<2x128x256xbf16, #tpu.memory_space<vmem>> -> memref<1x128x256xbf16, #tpu.memory_space<vmem>>
    %16 = tpu.memref_squeeze %15 : memref<1x128x256xbf16, #tpu.memory_space<vmem>> -> memref<128x256xbf16, #tpu.memory_space<vmem>>
    %17 = tpu.memref_slice %arg6[%c1_i32_15] : memref<2x!tpu.dma_semaphore, #tpu.memory_space<semaphore_mem>> -> memref<1x!tpu.dma_semaphore, #tpu.memory_space<semaphore_mem>>
    %18 = tpu.memref_squeeze %17 : memref<1x!tpu.dma_semaphore, #tpu.memory_space<semaphore_mem>> -> memref<!tpu.dma_semaphore, #tpu.memory_space<semaphore_mem>>
    tpu.enqueue_dma source(%14 : memref<128x256xbf16, #tpu.memory_space<any>>) target(%16 : memref<128x256xbf16, #tpu.memory_space<vmem>>) target_semaphore(%18 : memref<!tpu.dma_semaphore, #tpu.memory_space<semaphore_mem>>)
    %c0_20 = arith.constant 0 : index
    %c0_21 = arith.constant 0 : index
    %19 = vector.load %arg3[%c0_20, %c0_21] : memref<8x64xf32, #tpu.memory_space<vmem>>, vector<1x64xf32>
    %20 = tpu.concatenate %6, %19 in 1 : vector<1x64xf32>, vector<1x64xf32> -> vector<1x128xf32>
    %21 = arith.truncf %20 : vector<1x128xf32> to vector<1x128xbf16>
    %c0_22 = arith.constant 0 : index
    %c0_23 = arith.constant 0 : index
    %c0_24 = arith.constant 0 : index
    %22 = vector.load %arg5[%c0_22, %c0_23, %c0_24] : memref<2x128x256xbf16, #tpu.memory_space<vmem>>, vector<1x128x256xbf16>
    %23 = vector.shape_cast %22 : vector<1x128x256xbf16> to vector<128x256xbf16>
    %cst = arith.constant dense<0.000000e+00> : vector<1x256xf32>
    %24 = tpu.matmul %21, %23, %cst {dimension_numbers = #tpu.dot_dimension_numbers<[1], [0], [0], [1], [0, 0, 1, 1], [], []>} : vector<1x128xbf16>, vector<128x256xbf16>, vector<1x256xf32> -> vector<1x256xf32>
    %c0_25 = arith.constant 0 : index
    %c0_26 = arith.constant 0 : index
    %25 = vector.load %arg2[%c0_25, %c0_26] : memref<8x256xf32, #tpu.memory_space<vmem>>, vector<1x256xf32>
    %26 = arith.addf %24, %25 : vector<1x256xf32>
    %27 = vector.extract_strided_slice %26 {offsets = [0, 0], sizes = [1, 64], strides = [1, 1]} : vector<1x256xf32> to vector<1x64xf32>
    %28 = arith.negf %27 : vector<1x64xf32>
    %29 = math.exp %28 : vector<1x64xf32>
    %cst_27 = arith.constant 1.000000e+00 : f32
    %30 = vector.broadcast %cst_27 : f32 to vector<1x64xf32>
    %31 = arith.addf %30, %29 : vector<1x64xf32>
    %32 = arith.divf %30, %31 : vector<1x64xf32>
    %33 = vector.extract_strided_slice %26 {offsets = [0, 64], sizes = [1, 64], strides = [1, 1]} : vector<1x256xf32> to vector<1x64xf32>
    %34 = arith.negf %33 : vector<1x64xf32>
    %35 = math.exp %34 : vector<1x64xf32>
    %cst_28 = arith.constant 1.000000e+00 : f32
    %36 = vector.broadcast %cst_28 : f32 to vector<1x64xf32>
    %37 = arith.addf %36, %35 : vector<1x64xf32>
    %38 = arith.divf %36, %37 : vector<1x64xf32>
    %39 = vector.extract_strided_slice %26 {offsets = [0, 128], sizes = [1, 64], strides = [1, 1]} : vector<1x256xf32> to vector<1x64xf32>
    %40 = vector.extract_strided_slice %26 {offsets = [0, 192], sizes = [1, 64], strides = [1, 1]} : vector<1x256xf32> to vector<1x64xf32>
    %41 = arith.mulf %32, %40 : vector<1x64xf32>
    %42 = arith.addf %39, %41 : vector<1x64xf32>
    %43 = math.tanh %42 : vector<1x64xf32>
    %cst_29 = arith.constant 1.000000e+00 : f32
    %44 = vector.broadcast %cst_29 : f32 to vector<1x64xf32>
    %45 = arith.subf %44, %38 : vector<1x64xf32>
    %46 = arith.mulf %45, %43 : vector<1x64xf32>
    %47 = arith.mulf %38, %19 : vector<1x64xf32>
    %48 = arith.addf %46, %47 : vector<1x64xf32>
    %c1_i32_30 = arith.constant 1 : i32
    %c1_i32_31 = arith.constant 1 : i32
    %c1_i32_32 = arith.constant 1 : i32
    %c0_i32_33 = arith.constant 0 : i32
    %c0_i32_34 = arith.constant 0 : i32
    %49 = tpu.memref_slice %arg1[%c1_i32_30, %c0_i32_33, %c0_i32_34] : memref<8x128x256xbf16, #tpu.memory_space<any>> -> memref<1x128x256xbf16, #tpu.memory_space<any>>
    %50 = tpu.memref_squeeze %49 : memref<1x128x256xbf16, #tpu.memory_space<any>> -> memref<128x256xbf16, #tpu.memory_space<any>>
    %c0_i32_35 = arith.constant 0 : i32
    %c0_i32_36 = arith.constant 0 : i32
    %51 = tpu.memref_slice %arg5[%c1_i32_31, %c0_i32_35, %c0_i32_36] : memref<2x128x256xbf16, #tpu.memory_space<vmem>> -> memref<1x128x256xbf16, #tpu.memory_space<vmem>>
    %52 = tpu.memref_squeeze %51 : memref<1x128x256xbf16, #tpu.memory_space<vmem>> -> memref<128x256xbf16, #tpu.memory_space<vmem>>
    %53 = tpu.memref_slice %arg6[%c1_i32_32] : memref<2x!tpu.dma_semaphore, #tpu.memory_space<semaphore_mem>> -> memref<1x!tpu.dma_semaphore, #tpu.memory_space<semaphore_mem>>
    %54 = tpu.memref_squeeze %53 : memref<1x!tpu.dma_semaphore, #tpu.memory_space<semaphore_mem>> -> memref<!tpu.dma_semaphore, #tpu.memory_space<semaphore_mem>>
    tpu.wait_dma2 semaphore(%54 : memref<!tpu.dma_semaphore, #tpu.memory_space<semaphore_mem>>) src(%50 : memref<128x256xbf16, #tpu.memory_space<any>>) dst(%52 : memref<128x256xbf16, #tpu.memory_space<vmem>>)
    %c2_i32 = arith.constant 2 : i32
    %c0_i32_37 = arith.constant 0 : i32
    %c0_i32_38 = arith.constant 0 : i32
    %c0_i32_39 = arith.constant 0 : i32
    %c0_i32_40 = arith.constant 0 : i32
    %55 = tpu.memref_slice %arg1[%c2_i32, %c0_i32_39, %c0_i32_40] : memref<8x128x256xbf16, #tpu.memory_space<any>> -> memref<1x128x256xbf16, #tpu.memory_space<any>>
    %56 = tpu.memref_squeeze %55 : memref<1x128x256xbf16, #tpu.memory_space<any>> -> memref<128x256xbf16, #tpu.memory_space<any>>
    %c0_i32_41 = arith.constant 0 : i32
    %c0_i32_42 = arith.constant 0 : i32
    %57 = tpu.memref_slice %arg5[%c0_i32_37, %c0_i32_41, %c0_i32_42] : memref<2x128x256xbf16, #tpu.memory_space<vmem>> -> memref<1x128x256xbf16, #tpu.memory_space<vmem>>
    %58 = tpu.memref_squeeze %57 : memref<1x128x256xbf16, #tpu.memory_space<vmem>> -> memref<128x256xbf16, #tpu.memory_space<vmem>>
    %59 = tpu.memref_slice %arg6[%c0_i32_38] : memref<2x!tpu.dma_semaphore, #tpu.memory_space<semaphore_mem>> -> memref<1x!tpu.dma_semaphore, #tpu.memory_space<semaphore_mem>>
    %60 = tpu.memref_squeeze %59 : memref<1x!tpu.dma_semaphore, #tpu.memory_space<semaphore_mem>> -> memref<!tpu.dma_semaphore, #tpu.memory_space<semaphore_mem>>
    tpu.enqueue_dma source(%56 : memref<128x256xbf16, #tpu.memory_space<any>>) target(%58 : memref<128x256xbf16, #tpu.memory_space<vmem>>) target_semaphore(%60 : memref<!tpu.dma_semaphore, #tpu.memory_space<semaphore_mem>>)
    %c1 = arith.constant 1 : index
    %c0_43 = arith.constant 0 : index
    %61 = vector.load %arg3[%c1, %c0_43] : memref<8x64xf32, #tpu.memory_space<vmem>>, vector<1x64xf32>
    %62 = tpu.concatenate %48, %61 in 1 : vector<1x64xf32>, vector<1x64xf32> -> vector<1x128xf32>
    %63 = arith.truncf %62 : vector<1x128xf32> to vector<1x128xbf16>
    %c1_44 = arith.constant 1 : index
    %c0_45 = arith.constant 0 : index
    %c0_46 = arith.constant 0 : index
    %64 = vector.load %arg5[%c1_44, %c0_45, %c0_46] : memref<2x128x256xbf16, #tpu.memory_space<vmem>>, vector<1x128x256xbf16>
    %65 = vector.shape_cast %64 : vector<1x128x256xbf16> to vector<128x256xbf16>
    %cst_47 = arith.constant dense<0.000000e+00> : vector<1x256xf32>
    %66 = tpu.matmul %63, %65, %cst_47 {dimension_numbers = #tpu.dot_dimension_numbers<[1], [0], [0], [1], [0, 0, 1, 1], [], []>} : vector<1x128xbf16>, vector<128x256xbf16>, vector<1x256xf32> -> vector<1x256xf32>
    %c1_48 = arith.constant 1 : index
    %c0_49 = arith.constant 0 : index
    %67 = vector.load %arg2[%c1_48, %c0_49] : memref<8x256xf32, #tpu.memory_space<vmem>>, vector<1x256xf32>
    %68 = arith.addf %66, %67 : vector<1x256xf32>
    %69 = vector.extract_strided_slice %68 {offsets = [0, 0], sizes = [1, 64], strides = [1, 1]} : vector<1x256xf32> to vector<1x64xf32>
    %70 = arith.negf %69 : vector<1x64xf32>
    %71 = math.exp %70 : vector<1x64xf32>
    %cst_50 = arith.constant 1.000000e+00 : f32
    %72 = vector.broadcast %cst_50 : f32 to vector<1x64xf32>
    %73 = arith.addf %72, %71 : vector<1x64xf32>
    %74 = arith.divf %72, %73 : vector<1x64xf32>
    %75 = vector.extract_strided_slice %68 {offsets = [0, 64], sizes = [1, 64], strides = [1, 1]} : vector<1x256xf32> to vector<1x64xf32>
    %76 = arith.negf %75 : vector<1x64xf32>
    %77 = math.exp %76 : vector<1x64xf32>
    %cst_51 = arith.constant 1.000000e+00 : f32
    %78 = vector.broadcast %cst_51 : f32 to vector<1x64xf32>
    %79 = arith.addf %78, %77 : vector<1x64xf32>
    %80 = arith.divf %78, %79 : vector<1x64xf32>
    %81 = vector.extract_strided_slice %68 {offsets = [0, 128], sizes = [1, 64], strides = [1, 1]} : vector<1x256xf32> to vector<1x64xf32>
    %82 = vector.extract_strided_slice %68 {offsets = [0, 192], sizes = [1, 64], strides = [1, 1]} : vector<1x256xf32> to vector<1x64xf32>
    %83 = arith.mulf %74, %82 : vector<1x64xf32>
    %84 = arith.addf %81, %83 : vector<1x64xf32>
    %85 = math.tanh %84 : vector<1x64xf32>
    %cst_52 = arith.constant 1.000000e+00 : f32
    %86 = vector.broadcast %cst_52 : f32 to vector<1x64xf32>
    %87 = arith.subf %86, %80 : vector<1x64xf32>
    %88 = arith.mulf %87, %85 : vector<1x64xf32>
    %89 = arith.mulf %80, %61 : vector<1x64xf32>
    %90 = arith.addf %88, %89 : vector<1x64xf32>
    %c2_i32_53 = arith.constant 2 : i32
    %c0_i32_54 = arith.constant 0 : i32
    %c0_i32_55 = arith.constant 0 : i32
    %c0_i32_56 = arith.constant 0 : i32
    %c0_i32_57 = arith.constant 0 : i32
    %91 = tpu.memref_slice %arg1[%c2_i32_53, %c0_i32_56, %c0_i32_57] : memref<8x128x256xbf16, #tpu.memory_space<any>> -> memref<1x128x256xbf16, #tpu.memory_space<any>>
    %92 = tpu.memref_squeeze %91 : memref<1x128x256xbf16, #tpu.memory_space<any>> -> memref<128x256xbf16, #tpu.memory_space<any>>
    %c0_i32_58 = arith.constant 0 : i32
    %c0_i32_59 = arith.constant 0 : i32
    %93 = tpu.memref_slice %arg5[%c0_i32_54, %c0_i32_58, %c0_i32_59] : memref<2x128x256xbf16, #tpu.memory_space<vmem>> -> memref<1x128x256xbf16, #tpu.memory_space<vmem>>
    %94 = tpu.memref_squeeze %93 : memref<1x128x256xbf16, #tpu.memory_space<vmem>> -> memref<128x256xbf16, #tpu.memory_space<vmem>>
    %95 = tpu.memref_slice %arg6[%c0_i32_55] : memref<2x!tpu.dma_semaphore, #tpu.memory_space<semaphore_mem>> -> memref<1x!tpu.dma_semaphore, #tpu.memory_space<semaphore_mem>>
    %96 = tpu.memref_squeeze %95 : memref<1x!tpu.dma_semaphore, #tpu.memory_space<semaphore_mem>> -> memref<!tpu.dma_semaphore, #tpu.memory_space<semaphore_mem>>
    tpu.wait_dma2 semaphore(%96 : memref<!tpu.dma_semaphore, #tpu.memory_space<semaphore_mem>>) src(%92 : memref<128x256xbf16, #tpu.memory_space<any>>) dst(%94 : memref<128x256xbf16, #tpu.memory_space<vmem>>)
    %c3_i32 = arith.constant 3 : i32
    %c1_i32_60 = arith.constant 1 : i32
    %c1_i32_61 = arith.constant 1 : i32
    %c0_i32_62 = arith.constant 0 : i32
    %c0_i32_63 = arith.constant 0 : i32
    %97 = tpu.memref_slice %arg1[%c3_i32, %c0_i32_62, %c0_i32_63] : memref<8x128x256xbf16, #tpu.memory_space<any>> -> memref<1x128x256xbf16, #tpu.memory_space<any>>
    %98 = tpu.memref_squeeze %97 : memref<1x128x256xbf16, #tpu.memory_space<any>> -> memref<128x256xbf16, #tpu.memory_space<any>>
    %c0_i32_64 = arith.constant 0 : i32
    %c0_i32_65 = arith.constant 0 : i32
    %99 = tpu.memref_slice %arg5[%c1_i32_60, %c0_i32_64, %c0_i32_65] : memref<2x128x256xbf16, #tpu.memory_space<vmem>> -> memref<1x128x256xbf16, #tpu.memory_space<vmem>>
    %100 = tpu.memref_squeeze %99 : memref<1x128x256xbf16, #tpu.memory_space<vmem>> -> memref<128x256xbf16, #tpu.memory_space<vmem>>
    %101 = tpu.memref_slice %arg6[%c1_i32_61] : memref<2x!tpu.dma_semaphore, #tpu.memory_space<semaphore_mem>> -> memref<1x!tpu.dma_semaphore, #tpu.memory_space<semaphore_mem>>
    %102 = tpu.memref_squeeze %101 : memref<1x!tpu.dma_semaphore, #tpu.memory_space<semaphore_mem>> -> memref<!tpu.dma_semaphore, #tpu.memory_space<semaphore_mem>>
    tpu.enqueue_dma source(%98 : memref<128x256xbf16, #tpu.memory_space<any>>) target(%100 : memref<128x256xbf16, #tpu.memory_space<vmem>>) target_semaphore(%102 : memref<!tpu.dma_semaphore, #tpu.memory_space<semaphore_mem>>)
    %c2 = arith.constant 2 : index
    %c0_66 = arith.constant 0 : index
    %103 = vector.load %arg3[%c2, %c0_66] : memref<8x64xf32, #tpu.memory_space<vmem>>, vector<1x64xf32>
    %104 = tpu.concatenate %90, %103 in 1 : vector<1x64xf32>, vector<1x64xf32> -> vector<1x128xf32>
    %105 = arith.truncf %104 : vector<1x128xf32> to vector<1x128xbf16>
    %c0_67 = arith.constant 0 : index
    %c0_68 = arith.constant 0 : index
    %c0_69 = arith.constant 0 : index
    %106 = vector.load %arg5[%c0_67, %c0_68, %c0_69] : memref<2x128x256xbf16, #tpu.memory_space<vmem>>, vector<1x128x256xbf16>
    %107 = vector.shape_cast %106 : vector<1x128x256xbf16> to vector<128x256xbf16>
    %cst_70 = arith.constant dense<0.000000e+00> : vector<1x256xf32>
    %108 = tpu.matmul %105, %107, %cst_70 {dimension_numbers = #tpu.dot_dimension_numbers<[1], [0], [0], [1], [0, 0, 1, 1], [], []>} : vector<1x128xbf16>, vector<128x256xbf16>, vector<1x256xf32> -> vector<1x256xf32>
    %c2_71 = arith.constant 2 : index
    %c0_72 = arith.constant 0 : index
    %109 = vector.load %arg2[%c2_71, %c0_72] : memref<8x256xf32, #tpu.memory_space<vmem>>, vector<1x256xf32>
    %110 = arith.addf %108, %109 : vector<1x256xf32>
    %111 = vector.extract_strided_slice %110 {offsets = [0, 0], sizes = [1, 64], strides = [1, 1]} : vector<1x256xf32> to vector<1x64xf32>
    %112 = arith.negf %111 : vector<1x64xf32>
    %113 = math.exp %112 : vector<1x64xf32>
    %cst_73 = arith.constant 1.000000e+00 : f32
    %114 = vector.broadcast %cst_73 : f32 to vector<1x64xf32>
    %115 = arith.addf %114, %113 : vector<1x64xf32>
    %116 = arith.divf %114, %115 : vector<1x64xf32>
    %117 = vector.extract_strided_slice %110 {offsets = [0, 64], sizes = [1, 64], strides = [1, 1]} : vector<1x256xf32> to vector<1x64xf32>
    %118 = arith.negf %117 : vector<1x64xf32>
    %119 = math.exp %118 : vector<1x64xf32>
    %cst_74 = arith.constant 1.000000e+00 : f32
    %120 = vector.broadcast %cst_74 : f32 to vector<1x64xf32>
    %121 = arith.addf %120, %119 : vector<1x64xf32>
    %122 = arith.divf %120, %121 : vector<1x64xf32>
    %123 = vector.extract_strided_slice %110 {offsets = [0, 128], sizes = [1, 64], strides = [1, 1]} : vector<1x256xf32> to vector<1x64xf32>
    %124 = vector.extract_strided_slice %110 {offsets = [0, 192], sizes = [1, 64], strides = [1, 1]} : vector<1x256xf32> to vector<1x64xf32>
    %125 = arith.mulf %116, %124 : vector<1x64xf32>
    %126 = arith.addf %123, %125 : vector<1x64xf32>
    %127 = math.tanh %126 : vector<1x64xf32>
    %cst_75 = arith.constant 1.000000e+00 : f32
    %128 = vector.broadcast %cst_75 : f32 to vector<1x64xf32>
    %129 = arith.subf %128, %122 : vector<1x64xf32>
    %130 = arith.mulf %129, %127 : vector<1x64xf32>
    %131 = arith.mulf %122, %103 : vector<1x64xf32>
    %132 = arith.addf %130, %131 : vector<1x64xf32>
    %c3_i32_76 = arith.constant 3 : i32
    %c1_i32_77 = arith.constant 1 : i32
    %c1_i32_78 = arith.constant 1 : i32
    %c0_i32_79 = arith.constant 0 : i32
    %c0_i32_80 = arith.constant 0 : i32
    %133 = tpu.memref_slice %arg1[%c3_i32_76, %c0_i32_79, %c0_i32_80] : memref<8x128x256xbf16, #tpu.memory_space<any>> -> memref<1x128x256xbf16, #tpu.memory_space<any>>
    %134 = tpu.memref_squeeze %133 : memref<1x128x256xbf16, #tpu.memory_space<any>> -> memref<128x256xbf16, #tpu.memory_space<any>>
    %c0_i32_81 = arith.constant 0 : i32
    %c0_i32_82 = arith.constant 0 : i32
    %135 = tpu.memref_slice %arg5[%c1_i32_77, %c0_i32_81, %c0_i32_82] : memref<2x128x256xbf16, #tpu.memory_space<vmem>> -> memref<1x128x256xbf16, #tpu.memory_space<vmem>>
    %136 = tpu.memref_squeeze %135 : memref<1x128x256xbf16, #tpu.memory_space<vmem>> -> memref<128x256xbf16, #tpu.memory_space<vmem>>
    %137 = tpu.memref_slice %arg6[%c1_i32_78] : memref<2x!tpu.dma_semaphore, #tpu.memory_space<semaphore_mem>> -> memref<1x!tpu.dma_semaphore, #tpu.memory_space<semaphore_mem>>
    %138 = tpu.memref_squeeze %137 : memref<1x!tpu.dma_semaphore, #tpu.memory_space<semaphore_mem>> -> memref<!tpu.dma_semaphore, #tpu.memory_space<semaphore_mem>>
    tpu.wait_dma2 semaphore(%138 : memref<!tpu.dma_semaphore, #tpu.memory_space<semaphore_mem>>) src(%134 : memref<128x256xbf16, #tpu.memory_space<any>>) dst(%136 : memref<128x256xbf16, #tpu.memory_space<vmem>>)
    %c4_i32 = arith.constant 4 : i32
    %c0_i32_83 = arith.constant 0 : i32
    %c0_i32_84 = arith.constant 0 : i32
    %c0_i32_85 = arith.constant 0 : i32
    %c0_i32_86 = arith.constant 0 : i32
    %139 = tpu.memref_slice %arg1[%c4_i32, %c0_i32_85, %c0_i32_86] : memref<8x128x256xbf16, #tpu.memory_space<any>> -> memref<1x128x256xbf16, #tpu.memory_space<any>>
    %140 = tpu.memref_squeeze %139 : memref<1x128x256xbf16, #tpu.memory_space<any>> -> memref<128x256xbf16, #tpu.memory_space<any>>
    %c0_i32_87 = arith.constant 0 : i32
    %c0_i32_88 = arith.constant 0 : i32
    %141 = tpu.memref_slice %arg5[%c0_i32_83, %c0_i32_87, %c0_i32_88] : memref<2x128x256xbf16, #tpu.memory_space<vmem>> -> memref<1x128x256xbf16, #tpu.memory_space<vmem>>
    %142 = tpu.memref_squeeze %141 : memref<1x128x256xbf16, #tpu.memory_space<vmem>> -> memref<128x256xbf16, #tpu.memory_space<vmem>>
    %143 = tpu.memref_slice %arg6[%c0_i32_84] : memref<2x!tpu.dma_semaphore, #tpu.memory_space<semaphore_mem>> -> memref<1x!tpu.dma_semaphore, #tpu.memory_space<semaphore_mem>>
    %144 = tpu.memref_squeeze %143 : memref<1x!tpu.dma_semaphore, #tpu.memory_space<semaphore_mem>> -> memref<!tpu.dma_semaphore, #tpu.memory_space<semaphore_mem>>
    tpu.enqueue_dma source(%140 : memref<128x256xbf16, #tpu.memory_space<any>>) target(%142 : memref<128x256xbf16, #tpu.memory_space<vmem>>) target_semaphore(%144 : memref<!tpu.dma_semaphore, #tpu.memory_space<semaphore_mem>>)
    %c3 = arith.constant 3 : index
    %c0_89 = arith.constant 0 : index
    %145 = vector.load %arg3[%c3, %c0_89] : memref<8x64xf32, #tpu.memory_space<vmem>>, vector<1x64xf32>
    %146 = tpu.concatenate %132, %145 in 1 : vector<1x64xf32>, vector<1x64xf32> -> vector<1x128xf32>
    %147 = arith.truncf %146 : vector<1x128xf32> to vector<1x128xbf16>
    %c1_90 = arith.constant 1 : index
    %c0_91 = arith.constant 0 : index
    %c0_92 = arith.constant 0 : index
    %148 = vector.load %arg5[%c1_90, %c0_91, %c0_92] : memref<2x128x256xbf16, #tpu.memory_space<vmem>>, vector<1x128x256xbf16>
    %149 = vector.shape_cast %148 : vector<1x128x256xbf16> to vector<128x256xbf16>
    %cst_93 = arith.constant dense<0.000000e+00> : vector<1x256xf32>
    %150 = tpu.matmul %147, %149, %cst_93 {dimension_numbers = #tpu.dot_dimension_numbers<[1], [0], [0], [1], [0, 0, 1, 1], [], []>} : vector<1x128xbf16>, vector<128x256xbf16>, vector<1x256xf32> -> vector<1x256xf32>
    %c3_94 = arith.constant 3 : index
    %c0_95 = arith.constant 0 : index
    %151 = vector.load %arg2[%c3_94, %c0_95] : memref<8x256xf32, #tpu.memory_space<vmem>>, vector<1x256xf32>
    %152 = arith.addf %150, %151 : vector<1x256xf32>
    %153 = vector.extract_strided_slice %152 {offsets = [0, 0], sizes = [1, 64], strides = [1, 1]} : vector<1x256xf32> to vector<1x64xf32>
    %154 = arith.negf %153 : vector<1x64xf32>
    %155 = math.exp %154 : vector<1x64xf32>
    %cst_96 = arith.constant 1.000000e+00 : f32
    %156 = vector.broadcast %cst_96 : f32 to vector<1x64xf32>
    %157 = arith.addf %156, %155 : vector<1x64xf32>
    %158 = arith.divf %156, %157 : vector<1x64xf32>
    %159 = vector.extract_strided_slice %152 {offsets = [0, 64], sizes = [1, 64], strides = [1, 1]} : vector<1x256xf32> to vector<1x64xf32>
    %160 = arith.negf %159 : vector<1x64xf32>
    %161 = math.exp %160 : vector<1x64xf32>
    %cst_97 = arith.constant 1.000000e+00 : f32
    %162 = vector.broadcast %cst_97 : f32 to vector<1x64xf32>
    %163 = arith.addf %162, %161 : vector<1x64xf32>
    %164 = arith.divf %162, %163 : vector<1x64xf32>
    %165 = vector.extract_strided_slice %152 {offsets = [0, 128], sizes = [1, 64], strides = [1, 1]} : vector<1x256xf32> to vector<1x64xf32>
    %166 = vector.extract_strided_slice %152 {offsets = [0, 192], sizes = [1, 64], strides = [1, 1]} : vector<1x256xf32> to vector<1x64xf32>
    %167 = arith.mulf %158, %166 : vector<1x64xf32>
    %168 = arith.addf %165, %167 : vector<1x64xf32>
    %169 = math.tanh %168 : vector<1x64xf32>
    %cst_98 = arith.constant 1.000000e+00 : f32
    %170 = vector.broadcast %cst_98 : f32 to vector<1x64xf32>
    %171 = arith.subf %170, %164 : vector<1x64xf32>
    %172 = arith.mulf %171, %169 : vector<1x64xf32>
    %173 = arith.mulf %164, %145 : vector<1x64xf32>
    %174 = arith.addf %172, %173 : vector<1x64xf32>
    %c4_i32_99 = arith.constant 4 : i32
    %c0_i32_100 = arith.constant 0 : i32
    %c0_i32_101 = arith.constant 0 : i32
    %c0_i32_102 = arith.constant 0 : i32
    %c0_i32_103 = arith.constant 0 : i32
    %175 = tpu.memref_slice %arg1[%c4_i32_99, %c0_i32_102, %c0_i32_103] : memref<8x128x256xbf16, #tpu.memory_space<any>> -> memref<1x128x256xbf16, #tpu.memory_space<any>>
    %176 = tpu.memref_squeeze %175 : memref<1x128x256xbf16, #tpu.memory_space<any>> -> memref<128x256xbf16, #tpu.memory_space<any>>
    %c0_i32_104 = arith.constant 0 : i32
    %c0_i32_105 = arith.constant 0 : i32
    %177 = tpu.memref_slice %arg5[%c0_i32_100, %c0_i32_104, %c0_i32_105] : memref<2x128x256xbf16, #tpu.memory_space<vmem>> -> memref<1x128x256xbf16, #tpu.memory_space<vmem>>
    %178 = tpu.memref_squeeze %177 : memref<1x128x256xbf16, #tpu.memory_space<vmem>> -> memref<128x256xbf16, #tpu.memory_space<vmem>>
    %179 = tpu.memref_slice %arg6[%c0_i32_101] : memref<2x!tpu.dma_semaphore, #tpu.memory_space<semaphore_mem>> -> memref<1x!tpu.dma_semaphore, #tpu.memory_space<semaphore_mem>>
    %180 = tpu.memref_squeeze %179 : memref<1x!tpu.dma_semaphore, #tpu.memory_space<semaphore_mem>> -> memref<!tpu.dma_semaphore, #tpu.memory_space<semaphore_mem>>
    tpu.wait_dma2 semaphore(%180 : memref<!tpu.dma_semaphore, #tpu.memory_space<semaphore_mem>>) src(%176 : memref<128x256xbf16, #tpu.memory_space<any>>) dst(%178 : memref<128x256xbf16, #tpu.memory_space<vmem>>)
    %c5_i32 = arith.constant 5 : i32
    %c1_i32_106 = arith.constant 1 : i32
    %c1_i32_107 = arith.constant 1 : i32
    %c0_i32_108 = arith.constant 0 : i32
    %c0_i32_109 = arith.constant 0 : i32
    %181 = tpu.memref_slice %arg1[%c5_i32, %c0_i32_108, %c0_i32_109] : memref<8x128x256xbf16, #tpu.memory_space<any>> -> memref<1x128x256xbf16, #tpu.memory_space<any>>
    %182 = tpu.memref_squeeze %181 : memref<1x128x256xbf16, #tpu.memory_space<any>> -> memref<128x256xbf16, #tpu.memory_space<any>>
    %c0_i32_110 = arith.constant 0 : i32
    %c0_i32_111 = arith.constant 0 : i32
    %183 = tpu.memref_slice %arg5[%c1_i32_106, %c0_i32_110, %c0_i32_111] : memref<2x128x256xbf16, #tpu.memory_space<vmem>> -> memref<1x128x256xbf16, #tpu.memory_space<vmem>>
    %184 = tpu.memref_squeeze %183 : memref<1x128x256xbf16, #tpu.memory_space<vmem>> -> memref<128x256xbf16, #tpu.memory_space<vmem>>
    %185 = tpu.memref_slice %arg6[%c1_i32_107] : memref<2x!tpu.dma_semaphore, #tpu.memory_space<semaphore_mem>> -> memref<1x!tpu.dma_semaphore, #tpu.memory_space<semaphore_mem>>
    %186 = tpu.memref_squeeze %185 : memref<1x!tpu.dma_semaphore, #tpu.memory_space<semaphore_mem>> -> memref<!tpu.dma_semaphore, #tpu.memory_space<semaphore_mem>>
    tpu.enqueue_dma source(%182 : memref<128x256xbf16, #tpu.memory_space<any>>) target(%184 : memref<128x256xbf16, #tpu.memory_space<vmem>>) target_semaphore(%186 : memref<!tpu.dma_semaphore, #tpu.memory_space<semaphore_mem>>)
    %c4 = arith.constant 4 : index
    %c0_112 = arith.constant 0 : index
    %187 = vector.load %arg3[%c4, %c0_112] : memref<8x64xf32, #tpu.memory_space<vmem>>, vector<1x64xf32>
    %188 = tpu.concatenate %174, %187 in 1 : vector<1x64xf32>, vector<1x64xf32> -> vector<1x128xf32>
    %189 = arith.truncf %188 : vector<1x128xf32> to vector<1x128xbf16>
    %c0_113 = arith.constant 0 : index
    %c0_114 = arith.constant 0 : index
    %c0_115 = arith.constant 0 : index
    %190 = vector.load %arg5[%c0_113, %c0_114, %c0_115] : memref<2x128x256xbf16, #tpu.memory_space<vmem>>, vector<1x128x256xbf16>
    %191 = vector.shape_cast %190 : vector<1x128x256xbf16> to vector<128x256xbf16>
    %cst_116 = arith.constant dense<0.000000e+00> : vector<1x256xf32>
    %192 = tpu.matmul %189, %191, %cst_116 {dimension_numbers = #tpu.dot_dimension_numbers<[1], [0], [0], [1], [0, 0, 1, 1], [], []>} : vector<1x128xbf16>, vector<128x256xbf16>, vector<1x256xf32> -> vector<1x256xf32>
    %c4_117 = arith.constant 4 : index
    %c0_118 = arith.constant 0 : index
    %193 = vector.load %arg2[%c4_117, %c0_118] : memref<8x256xf32, #tpu.memory_space<vmem>>, vector<1x256xf32>
    %194 = arith.addf %192, %193 : vector<1x256xf32>
    %195 = vector.extract_strided_slice %194 {offsets = [0, 0], sizes = [1, 64], strides = [1, 1]} : vector<1x256xf32> to vector<1x64xf32>
    %196 = arith.negf %195 : vector<1x64xf32>
    %197 = math.exp %196 : vector<1x64xf32>
    %cst_119 = arith.constant 1.000000e+00 : f32
    %198 = vector.broadcast %cst_119 : f32 to vector<1x64xf32>
    %199 = arith.addf %198, %197 : vector<1x64xf32>
    %200 = arith.divf %198, %199 : vector<1x64xf32>
    %201 = vector.extract_strided_slice %194 {offsets = [0, 64], sizes = [1, 64], strides = [1, 1]} : vector<1x256xf32> to vector<1x64xf32>
    %202 = arith.negf %201 : vector<1x64xf32>
    %203 = math.exp %202 : vector<1x64xf32>
    %cst_120 = arith.constant 1.000000e+00 : f32
    %204 = vector.broadcast %cst_120 : f32 to vector<1x64xf32>
    %205 = arith.addf %204, %203 : vector<1x64xf32>
    %206 = arith.divf %204, %205 : vector<1x64xf32>
    %207 = vector.extract_strided_slice %194 {offsets = [0, 128], sizes = [1, 64], strides = [1, 1]} : vector<1x256xf32> to vector<1x64xf32>
    %208 = vector.extract_strided_slice %194 {offsets = [0, 192], sizes = [1, 64], strides = [1, 1]} : vector<1x256xf32> to vector<1x64xf32>
    %209 = arith.mulf %200, %208 : vector<1x64xf32>
    %210 = arith.addf %207, %209 : vector<1x64xf32>
    %211 = math.tanh %210 : vector<1x64xf32>
    %cst_121 = arith.constant 1.000000e+00 : f32
    %212 = vector.broadcast %cst_121 : f32 to vector<1x64xf32>
    %213 = arith.subf %212, %206 : vector<1x64xf32>
    %214 = arith.mulf %213, %211 : vector<1x64xf32>
    %215 = arith.mulf %206, %187 : vector<1x64xf32>
    %216 = arith.addf %214, %215 : vector<1x64xf32>
    %c5_i32_122 = arith.constant 5 : i32
    %c1_i32_123 = arith.constant 1 : i32
    %c1_i32_124 = arith.constant 1 : i32
    %c0_i32_125 = arith.constant 0 : i32
    %c0_i32_126 = arith.constant 0 : i32
    %217 = tpu.memref_slice %arg1[%c5_i32_122, %c0_i32_125, %c0_i32_126] : memref<8x128x256xbf16, #tpu.memory_space<any>> -> memref<1x128x256xbf16, #tpu.memory_space<any>>
    %218 = tpu.memref_squeeze %217 : memref<1x128x256xbf16, #tpu.memory_space<any>> -> memref<128x256xbf16, #tpu.memory_space<any>>
    %c0_i32_127 = arith.constant 0 : i32
    %c0_i32_128 = arith.constant 0 : i32
    %219 = tpu.memref_slice %arg5[%c1_i32_123, %c0_i32_127, %c0_i32_128] : memref<2x128x256xbf16, #tpu.memory_space<vmem>> -> memref<1x128x256xbf16, #tpu.memory_space<vmem>>
    %220 = tpu.memref_squeeze %219 : memref<1x128x256xbf16, #tpu.memory_space<vmem>> -> memref<128x256xbf16, #tpu.memory_space<vmem>>
    %221 = tpu.memref_slice %arg6[%c1_i32_124] : memref<2x!tpu.dma_semaphore, #tpu.memory_space<semaphore_mem>> -> memref<1x!tpu.dma_semaphore, #tpu.memory_space<semaphore_mem>>
    %222 = tpu.memref_squeeze %221 : memref<1x!tpu.dma_semaphore, #tpu.memory_space<semaphore_mem>> -> memref<!tpu.dma_semaphore, #tpu.memory_space<semaphore_mem>>
    tpu.wait_dma2 semaphore(%222 : memref<!tpu.dma_semaphore, #tpu.memory_space<semaphore_mem>>) src(%218 : memref<128x256xbf16, #tpu.memory_space<any>>) dst(%220 : memref<128x256xbf16, #tpu.memory_space<vmem>>)
    %c6_i32 = arith.constant 6 : i32
    %c0_i32_129 = arith.constant 0 : i32
    %c0_i32_130 = arith.constant 0 : i32
    %c0_i32_131 = arith.constant 0 : i32
    %c0_i32_132 = arith.constant 0 : i32
    %223 = tpu.memref_slice %arg1[%c6_i32, %c0_i32_131, %c0_i32_132] : memref<8x128x256xbf16, #tpu.memory_space<any>> -> memref<1x128x256xbf16, #tpu.memory_space<any>>
    %224 = tpu.memref_squeeze %223 : memref<1x128x256xbf16, #tpu.memory_space<any>> -> memref<128x256xbf16, #tpu.memory_space<any>>
    %c0_i32_133 = arith.constant 0 : i32
    %c0_i32_134 = arith.constant 0 : i32
    %225 = tpu.memref_slice %arg5[%c0_i32_129, %c0_i32_133, %c0_i32_134] : memref<2x128x256xbf16, #tpu.memory_space<vmem>> -> memref<1x128x256xbf16, #tpu.memory_space<vmem>>
    %226 = tpu.memref_squeeze %225 : memref<1x128x256xbf16, #tpu.memory_space<vmem>> -> memref<128x256xbf16, #tpu.memory_space<vmem>>
    %227 = tpu.memref_slice %arg6[%c0_i32_130] : memref<2x!tpu.dma_semaphore, #tpu.memory_space<semaphore_mem>> -> memref<1x!tpu.dma_semaphore, #tpu.memory_space<semaphore_mem>>
    %228 = tpu.memref_squeeze %227 : memref<1x!tpu.dma_semaphore, #tpu.memory_space<semaphore_mem>> -> memref<!tpu.dma_semaphore, #tpu.memory_space<semaphore_mem>>
    tpu.enqueue_dma source(%224 : memref<128x256xbf16, #tpu.memory_space<any>>) target(%226 : memref<128x256xbf16, #tpu.memory_space<vmem>>) target_semaphore(%228 : memref<!tpu.dma_semaphore, #tpu.memory_space<semaphore_mem>>)
    %c5 = arith.constant 5 : index
    %c0_135 = arith.constant 0 : index
    %229 = vector.load %arg3[%c5, %c0_135] : memref<8x64xf32, #tpu.memory_space<vmem>>, vector<1x64xf32>
    %230 = tpu.concatenate %216, %229 in 1 : vector<1x64xf32>, vector<1x64xf32> -> vector<1x128xf32>
    %231 = arith.truncf %230 : vector<1x128xf32> to vector<1x128xbf16>
    %c1_136 = arith.constant 1 : index
    %c0_137 = arith.constant 0 : index
    %c0_138 = arith.constant 0 : index
    %232 = vector.load %arg5[%c1_136, %c0_137, %c0_138] : memref<2x128x256xbf16, #tpu.memory_space<vmem>>, vector<1x128x256xbf16>
    %233 = vector.shape_cast %232 : vector<1x128x256xbf16> to vector<128x256xbf16>
    %cst_139 = arith.constant dense<0.000000e+00> : vector<1x256xf32>
    %234 = tpu.matmul %231, %233, %cst_139 {dimension_numbers = #tpu.dot_dimension_numbers<[1], [0], [0], [1], [0, 0, 1, 1], [], []>} : vector<1x128xbf16>, vector<128x256xbf16>, vector<1x256xf32> -> vector<1x256xf32>
    %c5_140 = arith.constant 5 : index
    %c0_141 = arith.constant 0 : index
    %235 = vector.load %arg2[%c5_140, %c0_141] : memref<8x256xf32, #tpu.memory_space<vmem>>, vector<1x256xf32>
    %236 = arith.addf %234, %235 : vector<1x256xf32>
    %237 = vector.extract_strided_slice %236 {offsets = [0, 0], sizes = [1, 64], strides = [1, 1]} : vector<1x256xf32> to vector<1x64xf32>
    %238 = arith.negf %237 : vector<1x64xf32>
    %239 = math.exp %238 : vector<1x64xf32>
    %cst_142 = arith.constant 1.000000e+00 : f32
    %240 = vector.broadcast %cst_142 : f32 to vector<1x64xf32>
    %241 = arith.addf %240, %239 : vector<1x64xf32>
    %242 = arith.divf %240, %241 : vector<1x64xf32>
    %243 = vector.extract_strided_slice %236 {offsets = [0, 64], sizes = [1, 64], strides = [1, 1]} : vector<1x256xf32> to vector<1x64xf32>
    %244 = arith.negf %243 : vector<1x64xf32>
    %245 = math.exp %244 : vector<1x64xf32>
    %cst_143 = arith.constant 1.000000e+00 : f32
    %246 = vector.broadcast %cst_143 : f32 to vector<1x64xf32>
    %247 = arith.addf %246, %245 : vector<1x64xf32>
    %248 = arith.divf %246, %247 : vector<1x64xf32>
    %249 = vector.extract_strided_slice %236 {offsets = [0, 128], sizes = [1, 64], strides = [1, 1]} : vector<1x256xf32> to vector<1x64xf32>
    %250 = vector.extract_strided_slice %236 {offsets = [0, 192], sizes = [1, 64], strides = [1, 1]} : vector<1x256xf32> to vector<1x64xf32>
    %251 = arith.mulf %242, %250 : vector<1x64xf32>
    %252 = arith.addf %249, %251 : vector<1x64xf32>
    %253 = math.tanh %252 : vector<1x64xf32>
    %cst_144 = arith.constant 1.000000e+00 : f32
    %254 = vector.broadcast %cst_144 : f32 to vector<1x64xf32>
    %255 = arith.subf %254, %248 : vector<1x64xf32>
    %256 = arith.mulf %255, %253 : vector<1x64xf32>
    %257 = arith.mulf %248, %229 : vector<1x64xf32>
    %258 = arith.addf %256, %257 : vector<1x64xf32>
    %c6_i32_145 = arith.constant 6 : i32
    %c0_i32_146 = arith.constant 0 : i32
    %c0_i32_147 = arith.constant 0 : i32
    %c0_i32_148 = arith.constant 0 : i32
    %c0_i32_149 = arith.constant 0 : i32
    %259 = tpu.memref_slice %arg1[%c6_i32_145, %c0_i32_148, %c0_i32_149] : memref<8x128x256xbf16, #tpu.memory_space<any>> -> memref<1x128x256xbf16, #tpu.memory_space<any>>
    %260 = tpu.memref_squeeze %259 : memref<1x128x256xbf16, #tpu.memory_space<any>> -> memref<128x256xbf16, #tpu.memory_space<any>>
    %c0_i32_150 = arith.constant 0 : i32
    %c0_i32_151 = arith.constant 0 : i32
    %261 = tpu.memref_slice %arg5[%c0_i32_146, %c0_i32_150, %c0_i32_151] : memref<2x128x256xbf16, #tpu.memory_space<vmem>> -> memref<1x128x256xbf16, #tpu.memory_space<vmem>>
    %262 = tpu.memref_squeeze %261 : memref<1x128x256xbf16, #tpu.memory_space<vmem>> -> memref<128x256xbf16, #tpu.memory_space<vmem>>
    %263 = tpu.memref_slice %arg6[%c0_i32_147] : memref<2x!tpu.dma_semaphore, #tpu.memory_space<semaphore_mem>> -> memref<1x!tpu.dma_semaphore, #tpu.memory_space<semaphore_mem>>
    %264 = tpu.memref_squeeze %263 : memref<1x!tpu.dma_semaphore, #tpu.memory_space<semaphore_mem>> -> memref<!tpu.dma_semaphore, #tpu.memory_space<semaphore_mem>>
    tpu.wait_dma2 semaphore(%264 : memref<!tpu.dma_semaphore, #tpu.memory_space<semaphore_mem>>) src(%260 : memref<128x256xbf16, #tpu.memory_space<any>>) dst(%262 : memref<128x256xbf16, #tpu.memory_space<vmem>>)
    %c7_i32 = arith.constant 7 : i32
    %c1_i32_152 = arith.constant 1 : i32
    %c1_i32_153 = arith.constant 1 : i32
    %c0_i32_154 = arith.constant 0 : i32
    %c0_i32_155 = arith.constant 0 : i32
    %265 = tpu.memref_slice %arg1[%c7_i32, %c0_i32_154, %c0_i32_155] : memref<8x128x256xbf16, #tpu.memory_space<any>> -> memref<1x128x256xbf16, #tpu.memory_space<any>>
    %266 = tpu.memref_squeeze %265 : memref<1x128x256xbf16, #tpu.memory_space<any>> -> memref<128x256xbf16, #tpu.memory_space<any>>
    %c0_i32_156 = arith.constant 0 : i32
    %c0_i32_157 = arith.constant 0 : i32
    %267 = tpu.memref_slice %arg5[%c1_i32_152, %c0_i32_156, %c0_i32_157] : memref<2x128x256xbf16, #tpu.memory_space<vmem>> -> memref<1x128x256xbf16, #tpu.memory_space<vmem>>
    %268 = tpu.memref_squeeze %267 : memref<1x128x256xbf16, #tpu.memory_space<vmem>> -> memref<128x256xbf16, #tpu.memory_space<vmem>>
    %269 = tpu.memref_slice %arg6[%c1_i32_153] : memref<2x!tpu.dma_semaphore, #tpu.memory_space<semaphore_mem>> -> memref<1x!tpu.dma_semaphore, #tpu.memory_space<semaphore_mem>>
    %270 = tpu.memref_squeeze %269 : memref<1x!tpu.dma_semaphore, #tpu.memory_space<semaphore_mem>> -> memref<!tpu.dma_semaphore, #tpu.memory_space<semaphore_mem>>
    tpu.enqueue_dma source(%266 : memref<128x256xbf16, #tpu.memory_space<any>>) target(%268 : memref<128x256xbf16, #tpu.memory_space<vmem>>) target_semaphore(%270 : memref<!tpu.dma_semaphore, #tpu.memory_space<semaphore_mem>>)
    %c6 = arith.constant 6 : index
    %c0_158 = arith.constant 0 : index
    %271 = vector.load %arg3[%c6, %c0_158] : memref<8x64xf32, #tpu.memory_space<vmem>>, vector<1x64xf32>
    %272 = tpu.concatenate %258, %271 in 1 : vector<1x64xf32>, vector<1x64xf32> -> vector<1x128xf32>
    %273 = arith.truncf %272 : vector<1x128xf32> to vector<1x128xbf16>
    %c0_159 = arith.constant 0 : index
    %c0_160 = arith.constant 0 : index
    %c0_161 = arith.constant 0 : index
    %274 = vector.load %arg5[%c0_159, %c0_160, %c0_161] : memref<2x128x256xbf16, #tpu.memory_space<vmem>>, vector<1x128x256xbf16>
    %275 = vector.shape_cast %274 : vector<1x128x256xbf16> to vector<128x256xbf16>
    %cst_162 = arith.constant dense<0.000000e+00> : vector<1x256xf32>
    %276 = tpu.matmul %273, %275, %cst_162 {dimension_numbers = #tpu.dot_dimension_numbers<[1], [0], [0], [1], [0, 0, 1, 1], [], []>} : vector<1x128xbf16>, vector<128x256xbf16>, vector<1x256xf32> -> vector<1x256xf32>
    %c6_163 = arith.constant 6 : index
    %c0_164 = arith.constant 0 : index
    %277 = vector.load %arg2[%c6_163, %c0_164] : memref<8x256xf32, #tpu.memory_space<vmem>>, vector<1x256xf32>
    %278 = arith.addf %276, %277 : vector<1x256xf32>
    %279 = vector.extract_strided_slice %278 {offsets = [0, 0], sizes = [1, 64], strides = [1, 1]} : vector<1x256xf32> to vector<1x64xf32>
    %280 = arith.negf %279 : vector<1x64xf32>
    %281 = math.exp %280 : vector<1x64xf32>
    %cst_165 = arith.constant 1.000000e+00 : f32
    %282 = vector.broadcast %cst_165 : f32 to vector<1x64xf32>
    %283 = arith.addf %282, %281 : vector<1x64xf32>
    %284 = arith.divf %282, %283 : vector<1x64xf32>
    %285 = vector.extract_strided_slice %278 {offsets = [0, 64], sizes = [1, 64], strides = [1, 1]} : vector<1x256xf32> to vector<1x64xf32>
    %286 = arith.negf %285 : vector<1x64xf32>
    %287 = math.exp %286 : vector<1x64xf32>
    %cst_166 = arith.constant 1.000000e+00 : f32
    %288 = vector.broadcast %cst_166 : f32 to vector<1x64xf32>
    %289 = arith.addf %288, %287 : vector<1x64xf32>
    %290 = arith.divf %288, %289 : vector<1x64xf32>
    %291 = vector.extract_strided_slice %278 {offsets = [0, 128], sizes = [1, 64], strides = [1, 1]} : vector<1x256xf32> to vector<1x64xf32>
    %292 = vector.extract_strided_slice %278 {offsets = [0, 192], sizes = [1, 64], strides = [1, 1]} : vector<1x256xf32> to vector<1x64xf32>
    %293 = arith.mulf %284, %292 : vector<1x64xf32>
    %294 = arith.addf %291, %293 : vector<1x64xf32>
    %295 = math.tanh %294 : vector<1x64xf32>
    %cst_167 = arith.constant 1.000000e+00 : f32
    %296 = vector.broadcast %cst_167 : f32 to vector<1x64xf32>
    %297 = arith.subf %296, %290 : vector<1x64xf32>
    %298 = arith.mulf %297, %295 : vector<1x64xf32>
    %299 = arith.mulf %290, %271 : vector<1x64xf32>
    %300 = arith.addf %298, %299 : vector<1x64xf32>
    %c7_i32_168 = arith.constant 7 : i32
    %c1_i32_169 = arith.constant 1 : i32
    %c1_i32_170 = arith.constant 1 : i32
    %c0_i32_171 = arith.constant 0 : i32
    %c0_i32_172 = arith.constant 0 : i32
    %301 = tpu.memref_slice %arg1[%c7_i32_168, %c0_i32_171, %c0_i32_172] : memref<8x128x256xbf16, #tpu.memory_space<any>> -> memref<1x128x256xbf16, #tpu.memory_space<any>>
    %302 = tpu.memref_squeeze %301 : memref<1x128x256xbf16, #tpu.memory_space<any>> -> memref<128x256xbf16, #tpu.memory_space<any>>
    %c0_i32_173 = arith.constant 0 : i32
    %c0_i32_174 = arith.constant 0 : i32
    %303 = tpu.memref_slice %arg5[%c1_i32_169, %c0_i32_173, %c0_i32_174] : memref<2x128x256xbf16, #tpu.memory_space<vmem>> -> memref<1x128x256xbf16, #tpu.memory_space<vmem>>
    %304 = tpu.memref_squeeze %303 : memref<1x128x256xbf16, #tpu.memory_space<vmem>> -> memref<128x256xbf16, #tpu.memory_space<vmem>>
    %305 = tpu.memref_slice %arg6[%c1_i32_170] : memref<2x!tpu.dma_semaphore, #tpu.memory_space<semaphore_mem>> -> memref<1x!tpu.dma_semaphore, #tpu.memory_space<semaphore_mem>>
    %306 = tpu.memref_squeeze %305 : memref<1x!tpu.dma_semaphore, #tpu.memory_space<semaphore_mem>> -> memref<!tpu.dma_semaphore, #tpu.memory_space<semaphore_mem>>
    tpu.wait_dma2 semaphore(%306 : memref<!tpu.dma_semaphore, #tpu.memory_space<semaphore_mem>>) src(%302 : memref<128x256xbf16, #tpu.memory_space<any>>) dst(%304 : memref<128x256xbf16, #tpu.memory_space<vmem>>)
    %c7 = arith.constant 7 : index
    %c0_175 = arith.constant 0 : index
    %307 = vector.load %arg3[%c7, %c0_175] : memref<8x64xf32, #tpu.memory_space<vmem>>, vector<1x64xf32>
    %308 = tpu.concatenate %300, %307 in 1 : vector<1x64xf32>, vector<1x64xf32> -> vector<1x128xf32>
    %309 = arith.truncf %308 : vector<1x128xf32> to vector<1x128xbf16>
    %c1_176 = arith.constant 1 : index
    %c0_177 = arith.constant 0 : index
    %c0_178 = arith.constant 0 : index
    %310 = vector.load %arg5[%c1_176, %c0_177, %c0_178] : memref<2x128x256xbf16, #tpu.memory_space<vmem>>, vector<1x128x256xbf16>
    %311 = vector.shape_cast %310 : vector<1x128x256xbf16> to vector<128x256xbf16>
    %cst_179 = arith.constant dense<0.000000e+00> : vector<1x256xf32>
    %312 = tpu.matmul %309, %311, %cst_179 {dimension_numbers = #tpu.dot_dimension_numbers<[1], [0], [0], [1], [0, 0, 1, 1], [], []>} : vector<1x128xbf16>, vector<128x256xbf16>, vector<1x256xf32> -> vector<1x256xf32>
    %c7_180 = arith.constant 7 : index
    %c0_181 = arith.constant 0 : index
    %313 = vector.load %arg2[%c7_180, %c0_181] : memref<8x256xf32, #tpu.memory_space<vmem>>, vector<1x256xf32>
    %314 = arith.addf %312, %313 : vector<1x256xf32>
    %315 = vector.extract_strided_slice %314 {offsets = [0, 0], sizes = [1, 64], strides = [1, 1]} : vector<1x256xf32> to vector<1x64xf32>
    %316 = arith.negf %315 : vector<1x64xf32>
    %317 = math.exp %316 : vector<1x64xf32>
    %cst_182 = arith.constant 1.000000e+00 : f32
    %318 = vector.broadcast %cst_182 : f32 to vector<1x64xf32>
    %319 = arith.addf %318, %317 : vector<1x64xf32>
    %320 = arith.divf %318, %319 : vector<1x64xf32>
    %321 = vector.extract_strided_slice %314 {offsets = [0, 64], sizes = [1, 64], strides = [1, 1]} : vector<1x256xf32> to vector<1x64xf32>
    %322 = arith.negf %321 : vector<1x64xf32>
    %323 = math.exp %322 : vector<1x64xf32>
    %cst_183 = arith.constant 1.000000e+00 : f32
    %324 = vector.broadcast %cst_183 : f32 to vector<1x64xf32>
    %325 = arith.addf %324, %323 : vector<1x64xf32>
    %326 = arith.divf %324, %325 : vector<1x64xf32>
    %327 = vector.extract_strided_slice %314 {offsets = [0, 128], sizes = [1, 64], strides = [1, 1]} : vector<1x256xf32> to vector<1x64xf32>
    %328 = vector.extract_strided_slice %314 {offsets = [0, 192], sizes = [1, 64], strides = [1, 1]} : vector<1x256xf32> to vector<1x64xf32>
    %329 = arith.mulf %320, %328 : vector<1x64xf32>
    %330 = arith.addf %327, %329 : vector<1x64xf32>
    %331 = math.tanh %330 : vector<1x64xf32>
    %cst_184 = arith.constant 1.000000e+00 : f32
    %332 = vector.broadcast %cst_184 : f32 to vector<1x64xf32>
    %333 = arith.subf %332, %326 : vector<1x64xf32>
    %334 = arith.mulf %333, %331 : vector<1x64xf32>
    %335 = arith.mulf %326, %307 : vector<1x64xf32>
    %336 = arith.addf %334, %335 : vector<1x64xf32>
    %337 = tpu.concatenate %48, %90, %132, %174, %216, %258, %300, %336 in 1 : vector<1x64xf32>, vector<1x64xf32>, vector<1x64xf32>, vector<1x64xf32>, vector<1x64xf32>, vector<1x64xf32>, vector<1x64xf32>, vector<1x64xf32> -> vector<1x512xf32>
    %c0_185 = arith.constant 0 : index
    %c0_186 = arith.constant 0 : index
    %338 = vector.load %arg4[%c0_185, %c0_186] : memref<1x512xf32, #tpu.memory_space<vmem>>, vector<1x512xf32>
    tpu.vector_store %arg4[%c0_185, %c0_186], %337 {strides = array<i32>} : memref<1x512xf32, #tpu.memory_space<vmem>>, vector<1x512xf32>,
    return
  }
}

</mosaic_0001>

<bundles_post_ra>
// kernel: multilayer_bigru_forward.1
= control target key start
LH: loop header
LB: loop body
LE: loop exit
PB: predicated region body
PF: predicated region fallthrough
CT: control target
= control target key end

     0   :  { %s20_s15 = sld [smem:[#allocation0]]   ;;  %s1300_s16 = smov [#allocation2]   ;;  %s1626_s0 = inlined_call_operand.vmem [shape: f32[1,64], index: 0, kind: input, shape index: {}]   ;;  %s1627_s1 = inlined_call_operand.hbm [shape: bf16[8,128,256], index: 1, kind: input, shape index: {}]   ;;  %s1628_s2 = inlined_call_operand.vmem [shape: f32[8,256], index: 2, kind: input, shape index: {}]   ;;  %s1629_s3 = inlined_call_operand.vmem [shape: f32[8,64], index: 3, kind: input, shape index: {}]   ;;  %s1630_s4 = inlined_call_operand.vmem [shape: f32[1,512], index: 4, kind: output, shape index: {}]  }
   0x1   :  { %s28_s17 = sshll.u32 %s1300_s16, 4  ;;  %s1301_s18 = smov 256   ;;  %s1344_s17 = int_to_ptr.vmem [resolvable:$true] %s28_s17 }
   0x2   :  { %32 = sst [smem:[#allocation5]] %s1301_s18  ;;  %s1302_s19 = smov 2  }
   0x3   :  { %34 = sst [smem:[#allocation5 + $0x1]] %s1301_s18  ;;  %s1303_s20 = smov 64  }
   0x4   :  { %36 = sst [smem:[#allocation5 + $0x2]] %s1302_s19  ;;  %s1304_s22 = smov 128  }
   0x5   :  { %38 = sst [smem:[#allocation5 + $0x3]] %s1303_s20  ;;  %s1305_s24 = smov 4  }
   0x6   :  { %s1184_s21 = sshll.u32 %s20_s15, 26  ;;  %40 = sst [smem:[#allocation5 + $0x4]] %s1304_s22 }
   0x7   :  { %s1351_s23 = sadd.s32 134217728, %s1184_s21  ;;  %42 = sst [smem:[#allocation5 + $0x5]] %s1302_s19 }
   0x8   :  { %44 = sst [smem:[#allocation5 + $0x6]] %s1304_s22  ;;  %s1306_s25 = smov [#allocation3]  }
   0x9   :  { %46 = sst [smem:[#allocation5 + $0x7]] %s1303_s20  ;;  %s1307_s26 = smov [#allocation4]  }
   0xa   :  { %48 = sst [smem:[#allocation5 + $0x8]] %s1305_s24 }
   0xb   :  { %50 = dma.general %s1627_s1, 2048, %s1344_s17, %s1306_s25, %s1307_s26, [#allocation5], %s1351_s23, 0  }
   0xc   :  { %v51_v0 = vld [vmem:[%s1626_s0] sm:$0x1] }
   0xd   :  { %1284 = dma.done.wait [#allocation3], 2048 }
   0xe   :  { %1285 = vsyncadd [#allocation3], 4294965248  ;;  %74 = sst [smem:[#allocation7]] %s1301_s18  ;;  %s1308_s5 = smov [#allocation2 + $0x80]   ;;  %v1309_v1 = vmov 0   ;;  %vm98_vm0 = vcmask 523264   ;;  %v119_v22 = vlaneseq }
   0xf   :  { %76 = sst [smem:[#allocation7 + $0x1]] %s1301_s18  ;;  %s70_s6 = sshll.u32 %s1308_s5, 4  ;;  %161 = vmatprep.mubr.bf16.mxu0 %v1309_v1  ;;  %s1374_s6 = int_to_ptr.vmem [resolvable:$true] %s70_s6 }
  0x10   :  { %78 = sst [smem:[#allocation7 + $0x2]] %s1302_s19  ;;  %s56_s9 = scalar_lea.hbm %s1627_s1, 2048  ;;  %v1390_v23 = vshrl.u32 %v119_v22, 7 }
  0x11   :  { %80 = sst [smem:[#allocation7 + $0x3]] %s1303_s20  ;;  %s1310_s0 = smov [#allocation3 + $0x1]  }
  0x12   :  { %82 = sst [smem:[#allocation7 + $0x4]] %s1304_s22  ;;  %s1311_s10 = smov [#allocation6]   ;;  %v1393_v24 = vsub.s32 1, %v1390_v23  ;;  %v1401_v32 = vsub.s32 0, %v1390_v23 }
  0x13   :  { %84 = sst [smem:[#allocation7 + $0x5]] %s1302_s19 }
  0x14   :  { %86 = sst [smem:[#allocation7 + $0x6]] %s1304_s22 }
  0x15   :  { %88 = sst [smem:[#allocation7 + $0x7]] %s1303_s20 }
  0x16   :  { %90 = sst [smem:[#allocation7 + $0x8]] %s1305_s24 }
  0x17   :  { %92 = dma.general %s56_s9, 2048, %s1374_s6, %s1310_s0, %s1311_s10, [#allocation7], %s1351_s23, 0  }
  0x18   :  { %v93_v2 = vld [vmem:[%s1629_s3] sm:$0x1]  ;;  %v102_v3 = vld [vmem:[#allocation2 + $0x8] sm:$0xff]  ;;  %v104_v5 = vld [vmem:[#allocation2 + $0x18] sm:$0xff] }
  0x19   :  { %v101_v4 = vld [vmem:[#allocation2] sm:$0xff]  ;;  %95 = vrot.lane.b32.xlu0 %v93_v2, %s1303_s20  ;;  %129 = vmatprep.subr.bf16.mxu0 %v102_v3  ;;  %v103_v6 = vld [vmem:[#allocation2 + $0x10] sm:$0xff]  ;;  %v106_v7 = vld [vmem:[#allocation2 + $0x28] sm:$0xff] }
  0x1a   :  { %130 = vmatpush1.bf16.msra.mxu0 %v101_v4  ;;  %v105_v8 = vld [vmem:[#allocation2 + $0x20] sm:$0xff]  ;;  %v108_v9 = vld [vmem:[#allocation2 + $0x38] sm:$0xff]  ;;  %v107_v10 = vld [vmem:[#allocation2 + $0x30] sm:$0xff] }
  0x1b   :  { %131 = vmatprep.subr.bf16.mxu0 %v104_v5  ;;  %v110_v11 = vld [vmem:[#allocation2 + $0x48] sm:$0xff]  ;;  %v109_v12 = vld [vmem:[#allocation2 + $0x40] sm:$0xff]  ;;  %v112_v13 = vld [vmem:[#allocation2 + $0x58] sm:$0xff] }
  0x1c   :  { %v111_v14 = vld [vmem:[#allocation2 + $0x50] sm:$0xff]  ;;  %v114_v15 = vld [vmem:[#allocation2 + $0x68] sm:$0xff]  ;;  %v113_v16 = vld [vmem:[#allocation2 + $0x60] sm:$0xff] }
  0x1d   :  { %v116_v17 = vld [vmem:[#allocation2 + $0x78] sm:$0xff]  ;;  %v115_v18 = vld [vmem:[#allocation2 + $0x70] sm:$0xff]  ;;  %v117_v25 = vld [vmem:[%s1628_s2] ss:$8 sm:$0x3] }
  0x1e   :  { %132 = vmatpush1.bf16.msra.mxu0 %v103_v6  ;;  %v126_v26 = vrot.slane %v117_v25, %v1393_v24  ;;  %v122_v33 = vrot.slane %v117_v25, %v1401_v32 }
  0x1f   :  { %133 = vmatprep.subr.bf16.mxu0 %v106_v7 }
  0x22   :  { %134 = vmatpush1.bf16.msra.mxu0 %v105_v8 }
  0x23   :  { %135 = vmatprep.subr.bf16.mxu0 %v108_v9 }
  0x26   :  { %136 = vmatpush1.bf16.msra.mxu0 %v107_v10 }
  0x27   :  { %137 = vmatprep.subr.bf16.mxu0 %v110_v11 }
  0x2a   :  { %138 = vmatpush1.bf16.msra.mxu0 %v109_v12 }
  0x2b   :  { %139 = vmatprep.subr.bf16.mxu0 %v112_v13 }
  0x2e   :  { %140 = vmatpush1.bf16.msra.mxu0 %v111_v14 }
  0x2f   :  { %141 = vmatprep.subr.bf16.mxu0 %v114_v15 }
  0x32   :  { %142 = vmatpush1.bf16.msra.mxu0 %v113_v16 }
  0x33   :  { %143 = vmatprep.subr.bf16.mxu0 %v116_v17 }
  0x36   :  { %144 = vmatpush1.bf16.msra.mxu0 %v115_v18 }
  0x8b   :  { %v96_v19 = vpop.permute.xlu0 %95 }
  0x8c   :  { %v99_v20 = vsel %vm98_vm0, %v51_v0, %v96_v19 }
  0x8d   :  { %v100_v21 = vpack.c.bf16 %v99_v20, %v99_v20 }
  0x8f   :  { %162 = vmatmul.mubr.bf16.vlgmr.msra.gmra.mrb[0].mxu0 %v100_v21 }
 0x162   :  { %v163_v27 = vpop.f32.mrb[0].mxu0 }
 0x163   :  { %v165_v28 = vpop.f32.mrb[1].mxu0  ;;  %v164_v34 = vadd.f32 %v163_v27, %v122_v33 }
 0x164   :  { %v166_v29 = vadd.f32 %v165_v28, %v126_v26  ;;  %v167_v30 = vpop.f32.mrb[2].mxu0 }
 0x165   :  { %v168_v31 = vpop.f32.mrb[3].mxu0  ;;  %v1188_v35 = vmul.f32 -1.442695, %v164_v34 }
 0x166   :  { %177 = vrot.lane.b32.xlu0 %v166_v29, %s1303_s20 }
 0x167   :  { %1236 = vpow2.f32 %v1188_v35 }
 0x171   :  { %v1237_v36 = vpop.eup %1236 }
 0x172   :  { %v173_v37 = vadd.f32 1.0, %v1237_v36 }
 0x174   :  { %1238 = vrcp.f32 %v173_v37 }
 0x17e   :  { %v1239_v38 = vpop.eup %1238 }
 0x17f   :  { %v183_v43 = vsub.f32 1.0, %v1239_v38  ;;  %v189_v45 = vmul.f32 %v1239_v38, %v96_v19 }
 0x1d8   :  { %v178_v39 = vpop.permute.xlu0 %177 }
 0x1d9   :  { %v180_v40 = vmul.f32 %v1239_v38, %v178_v39 }
 0x1db   :  { %v181_v41 = vadd.f32 %v180_v40, %v166_v29 }
 0x1dd   :  { %1240 = vtanh.f32 %v181_v41 }
 0x1e7   :  { %v1241_v42 = vpop.eup %1240 }
 0x1e8   :  { %185 = vrot.lane.b32.xlu1 %v1241_v42, %s1303_s20 }
 0x25a   :  { %v186_v44 = vpop.permute.xlu1 %185 }
 0x25b   :  { %v188_v46 = vmul.f32 %v186_v44, %v183_v43 }
 0x25d   :  { %v190_v47 = vadd.f32 %v189_v45, %v188_v46 }
 0x25e   :  { %1286 = dma.done.wait [#allocation3 + $0x1], 2048 }
 0x25f   :  { %1287 = vsyncadd [#allocation3 + $0x1], 4294965248  ;;  %230 = vrot.lane.b32.xlu0 %v190_v47, %s1303_s20  ;;  %300 = vmatprep.mubr.bf16.mxu1 %v1309_v1  ;;  %209 = sst [smem:[#allocation9]] %s1301_s18  ;;  %s193_s21 = scalar_lea.hbm %s1627_s1, 4096 }
 0x260   :  { %211 = sst [smem:[#allocation9 + $0x1]] %s1301_s18  ;;  %s1312_s26 = smov [#allocation8]  }
 0x261   :  { %213 = sst [smem:[#allocation9 + $0x2]] %s1302_s19 }
 0x262   :  { %215 = sst [smem:[#allocation9 + $0x3]] %s1303_s20 }
 0x263   :  { %217 = sst [smem:[#allocation9 + $0x4]] %s1304_s22 }
 0x264   :  { %219 = sst [smem:[#allocation9 + $0x5]] %s1302_s19 }
 0x265   :  { %221 = sst [smem:[#allocation9 + $0x6]] %s1304_s22 }
 0x266   :  { %223 = sst [smem:[#allocation9 + $0x7]] %s1303_s20 }
 0x267   :  { %225 = sst [smem:[#allocation9 + $0x8]] %s1305_s24 }
 0x268   :  { %227 = dma.general %s193_s21, 2048, %s1344_s17, %s1306_s25, %s1312_s26, [#allocation9], %s1351_s23, 0  }
 0x269   :  { %v228_v48 = vld [vmem:[%s1629_s3 + $0x1] sm:$0x1]  ;;  %v240_v49 = vld [vmem:[#allocation2 + $0x88] sm:$0xff]  ;;  %v242_v51 = vld [vmem:[#allocation2 + $0x98] sm:$0xff] }
 0x26a   :  { %v239_v50 = vld [vmem:[#allocation2 + $0x80] sm:$0xff]  ;;  %234 = vrot.lane.b32.xlu0 %v228_v48, %s1303_s20  ;;  %268 = vmatprep.subr.bf16.mxu1 %v240_v49  ;;  %v241_v52 = vld [vmem:[#allocation2 + $0x90] sm:$0xff]  ;;  %v244_v53 = vld [vmem:[#allocation2 + $0xa8] sm:$0xff] }
 0x26b   :  { %269 = vmatpush1.bf16.msra.mxu1 %v239_v50  ;;  %v243_v54 = vld [vmem:[#allocation2 + $0xa0] sm:$0xff]  ;;  %v246_v55 = vld [vmem:[#allocation2 + $0xb8] sm:$0xff]  ;;  %v245_v56 = vld [vmem:[#allocation2 + $0xb0] sm:$0xff] }
 0x26c   :  { %270 = vmatprep.subr.bf16.mxu1 %v242_v51  ;;  %v248_v57 = vld [vmem:[#allocation2 + $0xc8] sm:$0xff]  ;;  %v247_v58 = vld [vmem:[#allocation2 + $0xc0] sm:$0xff]  ;;  %v250_v59 = vld [vmem:[#allocation2 + $0xd8] sm:$0xff] }
 0x26d   :  { %v249_v60 = vld [vmem:[#allocation2 + $0xd0] sm:$0xff]  ;;  %v252_v61 = vld [vmem:[#allocation2 + $0xe8] sm:$0xff]  ;;  %v251_v62 = vld [vmem:[#allocation2 + $0xe0] sm:$0xff] }
 0x26e   :  { %v254_v63 = vld [vmem:[#allocation2 + $0xf8] sm:$0xff]  ;;  %v253_v0 = vld [vmem:[#allocation2 + $0xf0] sm:$0xff]  ;;  %v1191_v6 = vld [vmem:[%s1628_s2 + $0x1] ss:$8 sm:$0x3] }
 0x26f   :  { %271 = vmatpush1.bf16.msra.mxu1 %v241_v52  ;;  %v265_v7 = vrot.slane %v1191_v6, %v1393_v24  ;;  %v261_v13 = vrot.slane %v1191_v6, %v1401_v32 }
 0x270   :  { %272 = vmatprep.subr.bf16.mxu1 %v244_v53 }
 0x273   :  { %273 = vmatpush1.bf16.msra.mxu1 %v243_v54 }
 0x274   :  { %274 = vmatprep.subr.bf16.mxu1 %v246_v55 }
 0x277   :  { %275 = vmatpush1.bf16.msra.mxu1 %v245_v56 }
 0x278   :  { %276 = vmatprep.subr.bf16.mxu1 %v248_v57 }
 0x27b   :  { %277 = vmatpush1.bf16.msra.mxu1 %v247_v58 }
 0x27c   :  { %278 = vmatprep.subr.bf16.mxu1 %v250_v59 }
 0x27f   :  { %279 = vmatpush1.bf16.msra.mxu1 %v249_v60 }
 0x280   :  { %280 = vmatprep.subr.bf16.mxu1 %v252_v61 }
 0x283   :  { %281 = vmatpush1.bf16.msra.mxu1 %v251_v62 }
 0x284   :  { %282 = vmatprep.subr.bf16.mxu1 %v254_v63 }
 0x287   :  { %283 = vmatpush1.bf16.msra.mxu1 %v253_v0 }
 0x2d1   :  { %v1426_v2 = vpop.permute.xlu0 %230 }
 0x2dc   :  { %v235_v3 = vpop.permute.xlu0 %234 }
 0x2dd   :  { %v237_v4 = vsel %vm98_vm0, %v1426_v2, %v235_v3 }
 0x2de   :  { %v238_v5 = vpack.c.bf16 %v237_v4, %v237_v4 }
 0x2e0   :  { %301 = vmatmul.mubr.bf16.vlgmr.msra.gmra.mrb[0].mxu1 %v238_v5 }
 0x3b3   :  { %v302_v8 = vpop.f32.mrb[0].mxu1 }
 0x3b4   :  { %v304_v9 = vpop.f32.mrb[1].mxu1  ;;  %v303_v14 = vadd.f32 %v302_v8, %v261_v13 }
 0x3b5   :  { %v305_v10 = vadd.f32 %v304_v9, %v265_v7  ;;  %v306_v11 = vpop.f32.mrb[2].mxu1 }
 0x3b6   :  { %v307_v12 = vpop.f32.mrb[3].mxu1  ;;  %v1192_v15 = vmul.f32 -1.442695, %v303_v14 }
 0x3b7   :  { %316 = vrot.lane.b32.xlu1 %v305_v10, %s1303_s20 }
 0x3b8   :  { %1242 = vpow2.f32 %v1192_v15 }
 0x3c2   :  { %v1243_v16 = vpop.eup %1242 }
 0x3c3   :  { %v312_v17 = vadd.f32 1.0, %v1243_v16 }
 0x3c5   :  { %1244 = vrcp.f32 %v312_v17 }
 0x3cf   :  { %v1245_v18 = vpop.eup %1244 }
 0x3d0   :  { %v322_v26 = vsub.f32 1.0, %v1245_v18  ;;  %v328_v28 = vmul.f32 %v1245_v18, %v235_v3 }
 0x429   :  { %v317_v19 = vpop.permute.xlu1 %316 }
 0x42a   :  { %v319_v20 = vmul.f32 %v1245_v18, %v317_v19 }
 0x42c   :  { %v320_v21 = vadd.f32 %v319_v20, %v305_v10 }
 0x42e   :  { %1246 = vtanh.f32 %v320_v21 }
 0x438   :  { %v1247_v25 = vpop.eup %1246 }
 0x439   :  { %324 = vrot.lane.b32.xlu1 %v1247_v25, %s1303_s20 }
 0x4ab   :  { %v325_v27 = vpop.permute.xlu1 %324 }
 0x4ac   :  { %v327_v29 = vmul.f32 %v325_v27, %v322_v26 }
 0x4ae   :  { %v1437_v30 = vadd.f32 %v328_v28, %v327_v29 }
 0x4af   :  { %1288 = dma.done.wait [#allocation3], 2048 }
 0x4b0   :  { %1289 = vsyncadd [#allocation3], 4294965248  ;;  %369 = vrot.lane.b32.xlu0 %v1437_v30, %s1303_s20  ;;  %439 = vmatprep.mubr.bf16.mxu0 %v1309_v1  ;;  %348 = sst [smem:[#allocation11]] %s1301_s18  ;;  %s332_s8 = scalar_lea.hbm %s1627_s1, 6144 }
 0x4b1   :  { %350 = sst [smem:[#allocation11 + $0x1]] %s1301_s18  ;;  %s1313_s9 = smov [#allocation10]  }
 0x4b2   :  { %352 = sst [smem:[#allocation11 + $0x2]] %s1302_s19 }
 0x4b3   :  { %354 = sst [smem:[#allocation11 + $0x3]] %s1303_s20 }
 0x4b4   :  { %356 = sst [smem:[#allocation11 + $0x4]] %s1304_s22 }
 0x4b5   :  { %358 = sst [smem:[#allocation11 + $0x5]] %s1302_s19 }
 0x4b6   :  { %360 = sst [smem:[#allocation11 + $0x6]] %s1304_s22 }
 0x4b7   :  { %362 = sst [smem:[#allocation11 + $0x7]] %s1303_s20 }
 0x4b8   :  { %364 = sst [smem:[#allocation11 + $0x8]] %s1305_s24 }
 0x4b9   :  { %366 = dma.general %s332_s8, 2048, %s1374_s6, %s1310_s0, %s1313_s9, [#allocation11], %s1351_s23, 0  }
 0x4ba   :  { %v367_v31 = vld [vmem:[%s1629_s3 + $0x2] sm:$0x1]  ;;  %v379_v33 = vld [vmem:[#allocation2 + $0x8] sm:$0xff]  ;;  %v381_v35 = vld [vmem:[#allocation2 + $0x18] sm:$0xff] }
 0x4bb   :  { %v378_v34 = vld [vmem:[#allocation2] sm:$0xff]  ;;  %373 = vrot.lane.b32.xlu0 %v367_v31, %s1303_s20  ;;  %407 = vmatprep.subr.bf16.mxu0 %v379_v33  ;;  %v380_v36 = vld [vmem:[#allocation2 + $0x10] sm:$0xff]  ;;  %v383_v37 = vld [vmem:[#allocation2 + $0x28] sm:$0xff] }
 0x4bc   :  { %408 = vmatpush1.bf16.msra.mxu0 %v378_v34  ;;  %v382_v38 = vld [vmem:[#allocation2 + $0x20] sm:$0xff]  ;;  %v385_v39 = vld [vmem:[#allocation2 + $0x38] sm:$0xff]  ;;  %v384_v40 = vld [vmem:[#allocation2 + $0x30] sm:$0xff] }
 0x4bd   :  { %409 = vmatprep.subr.bf16.mxu0 %v381_v35  ;;  %v387_v41 = vld [vmem:[#allocation2 + $0x48] sm:$0xff]  ;;  %v386_v42 = vld [vmem:[#allocation2 + $0x40] sm:$0xff]  ;;  %v389_v43 = vld [vmem:[#allocation2 + $0x58] sm:$0xff] }
 0x4be   :  { %v388_v44 = vld [vmem:[#allocation2 + $0x50] sm:$0xff]  ;;  %v391_v45 = vld [vmem:[#allocation2 + $0x68] sm:$0xff]  ;;  %v390_v46 = vld [vmem:[#allocation2 + $0x60] sm:$0xff] }
 0x4bf   :  { %v393_v47 = vld [vmem:[#allocation2 + $0x78] sm:$0xff]  ;;  %v392_v48 = vld [vmem:[#allocation2 + $0x70] sm:$0xff]  ;;  %v1195_v53 = vld [vmem:[%s1628_s2 + $0x2] ss:$8 sm:$0x3] }
 0x4c0   :  { %410 = vmatpush1.bf16.msra.mxu0 %v380_v36  ;;  %v404_v54 = vrot.slane %v1195_v53, %v1393_v24  ;;  %v400_v60 = vrot.slane %v1195_v53, %v1401_v32 }
 0x4c1   :  { %411 = vmatprep.subr.bf16.mxu0 %v383_v37 }
 0x4c4   :  { %412 = vmatpush1.bf16.msra.mxu0 %v382_v38 }
 0x4c5   :  { %413 = vmatprep.subr.bf16.mxu0 %v385_v39 }
 0x4c8   :  { %414 = vmatpush1.bf16.msra.mxu0 %v384_v40 }
 0x4c9   :  { %415 = vmatprep.subr.bf16.mxu0 %v387_v41 }
 0x4cc   :  { %416 = vmatpush1.bf16.msra.mxu0 %v386_v42 }
 0x4cd   :  { %417 = vmatprep.subr.bf16.mxu0 %v389_v43 }
 0x4d0   :  { %418 = vmatpush1.bf16.msra.mxu0 %v388_v44 }
 0x4d1   :  { %419 = vmatprep.subr.bf16.mxu0 %v391_v45 }
 0x4d4   :  { %420 = vmatpush1.bf16.msra.mxu0 %v390_v46 }
 0x4d5   :  { %421 = vmatprep.subr.bf16.mxu0 %v393_v47 }
 0x4d8   :  { %422 = vmatpush1.bf16.msra.mxu0 %v392_v48 }
 0x522   :  { %v370_v49 = vpop.permute.xlu0 %369 }
 0x52d   :  { %v374_v50 = vpop.permute.xlu0 %373 }
 0x52e   :  { %v376_v51 = vsel %vm98_vm0, %v370_v49, %v374_v50 }
 0x52f   :  { %v377_v52 = vpack.c.bf16 %v376_v51, %v376_v51 }
 0x531   :  { %440 = vmatmul.mubr.bf16.vlgmr.msra.gmra.mrb[4].mxu0 %v377_v52 }
 0x604   :  { %v441_v55 = vpop.f32.mrb[4].mxu0 }
 0x605   :  { %v443_v56 = vpop.f32.mrb[5].mxu0  ;;  %v442_v61 = vadd.f32 %v441_v55, %v400_v60 }
 0x606   :  { %v444_v57 = vadd.f32 %v443_v56, %v404_v54  ;;  %v445_v58 = vpop.f32.mrb[6].mxu0 }
 0x607   :  { %v446_v59 = vpop.f32.mrb[7].mxu0  ;;  %v1196_v62 = vmul.f32 -1.442695, %v442_v61 }
 0x608   :  { %455 = vrot.lane.b32.xlu1 %v444_v57, %s1303_s20 }
 0x609   :  { %1248 = vpow2.f32 %v1196_v62 }
 0x613   :  { %v1249_v63 = vpop.eup %1248 }
 0x614   :  { %v451_v0 = vadd.f32 1.0, %v1249_v63 }
 0x616   :  { %1250 = vrcp.f32 %v451_v0 }
 0x620   :  { %v1251_v3 = vpop.eup %1250 }
 0x621   :  { %v461_v8 = vsub.f32 1.0, %v1251_v3  ;;  %v467_v10 = vmul.f32 %v1251_v3, %v374_v50 }
 0x67a   :  { %v456_v4 = vpop.permute.xlu1 %455 }
 0x67b   :  { %v458_v5 = vmul.f32 %v1251_v3, %v456_v4 }
 0x67d   :  { %v459_v6 = vadd.f32 %v458_v5, %v444_v57 }
 0x67f   :  { %1252 = vtanh.f32 %v459_v6 }
 0x689   :  { %v1253_v7 = vpop.eup %1252 }
 0x68a   :  { %463 = vrot.lane.b32.xlu1 %v1253_v7, %s1303_s20 }
 0x6fc   :  { %v464_v9 = vpop.permute.xlu1 %463 }
 0x6fd   :  { %v466_v11 = vmul.f32 %v464_v9, %v461_v8 }
 0x6ff   :  { %v468_v12 = vadd.f32 %v467_v10, %v466_v11 }
 0x700   :  { %1290 = dma.done.wait [#allocation3 + $0x1], 2048 }
 0x701   :  { %1291 = vsyncadd [#allocation3 + $0x1], 4294965248  ;;  %508 = vrot.lane.b32.xlu0 %v468_v12, %s1303_s20  ;;  %578 = vmatprep.mubr.bf16.mxu1 %v1309_v1  ;;  %487 = sst [smem:[#allocation13]] %s1301_s18  ;;  %s471_s16 = scalar_lea.hbm %s1627_s1, 8192 }
 0x702   :  { %489 = sst [smem:[#allocation13 + $0x1]] %s1301_s18  ;;  %s1314_s21 = smov [#allocation12]  }
 0x703   :  { %491 = sst [smem:[#allocation13 + $0x2]] %s1302_s19 }
 0x704   :  { %493 = sst [smem:[#allocation13 + $0x3]] %s1303_s20 }
 0x705   :  { %495 = sst [smem:[#allocation13 + $0x4]] %s1304_s22 }
 0x706   :  { %497 = sst [smem:[#allocation13 + $0x5]] %s1302_s19 }
 0x707   :  { %499 = sst [smem:[#allocation13 + $0x6]] %s1304_s22 }
 0x708   :  { %501 = sst [smem:[#allocation13 + $0x7]] %s1303_s20 }
 0x709   :  { %503 = sst [smem:[#allocation13 + $0x8]] %s1305_s24 }
 0x70a   :  { %505 = dma.general %s471_s16, 2048, %s1344_s17, %s1306_s25, %s1314_s21, [#allocation13], %s1351_s23, 0  }
 0x70b   :  { %v506_v13 = vld [vmem:[%s1629_s3 + $0x3] sm:$0x1]  ;;  %v518_v14 = vld [vmem:[#allocation2 + $0x88] sm:$0xff]  ;;  %v520_v16 = vld [vmem:[#allocation2 + $0x98] sm:$0xff] }
 0x70c   :  { %v517_v15 = vld [vmem:[#allocation2 + $0x80] sm:$0xff]  ;;  %512 = vrot.lane.b32.xlu0 %v506_v13, %s1303_s20  ;;  %546 = vmatprep.subr.bf16.mxu1 %v518_v14  ;;  %v519_v17 = vld [vmem:[#allocation2 + $0x90] sm:$0xff]  ;;  %v522_v18 = vld [vmem:[#allocation2 + $0xa8] sm:$0xff] }
 0x70d   :  { %547 = vmatpush1.bf16.msra.mxu1 %v517_v15  ;;  %v521_v19 = vld [vmem:[#allocation2 + $0xa0] sm:$0xff]  ;;  %v524_v20 = vld [vmem:[#allocation2 + $0xb8] sm:$0xff]  ;;  %v523_v21 = vld [vmem:[#allocation2 + $0xb0] sm:$0xff] }
 0x70e   :  { %548 = vmatprep.subr.bf16.mxu1 %v520_v16  ;;  %v526_v25 = vld [vmem:[#allocation2 + $0xc8] sm:$0xff]  ;;  %v525_v26 = vld [vmem:[#allocation2 + $0xc0] sm:$0xff]  ;;  %v528_v27 = vld [vmem:[#allocation2 + $0xd8] sm:$0xff] }
 0x70f   :  { %v527_v28 = vld [vmem:[#allocation2 + $0xd0] sm:$0xff]  ;;  %v530_v29 = vld [vmem:[#allocation2 + $0xe8] sm:$0xff]  ;;  %v529_v31 = vld [vmem:[#allocation2 + $0xe0] sm:$0xff] }
 0x710   :  { %v532_v33 = vld [vmem:[#allocation2 + $0xf8] sm:$0xff]  ;;  %v531_v34 = vld [vmem:[#allocation2 + $0xf0] sm:$0xff]  ;;  %v1199_v39 = vld [vmem:[%s1628_s2 + $0x3] ss:$8 sm:$0x3] }
 0x711   :  { %549 = vmatpush1.bf16.msra.mxu1 %v519_v17  ;;  %v543_v40 = vrot.slane %v1199_v39, %v1393_v24  ;;  %v539_v46 = vrot.slane %v1199_v39, %v1401_v32 }
 0x712   :  { %550 = vmatprep.subr.bf16.mxu1 %v522_v18 }
 0x715   :  { %551 = vmatpush1.bf16.msra.mxu1 %v521_v19 }
 0x716   :  { %552 = vmatprep.subr.bf16.mxu1 %v524_v20 }
 0x719   :  { %553 = vmatpush1.bf16.msra.mxu1 %v523_v21 }
 0x71a   :  { %554 = vmatprep.subr.bf16.mxu1 %v526_v25 }
 0x71d   :  { %555 = vmatpush1.bf16.msra.mxu1 %v525_v26 }
 0x71e   :  { %556 = vmatprep.subr.bf16.mxu1 %v528_v27 }
 0x721   :  { %557 = vmatpush1.bf16.msra.mxu1 %v527_v28 }
 0x722   :  { %558 = vmatprep.subr.bf16.mxu1 %v530_v29 }
 0x725   :  { %559 = vmatpush1.bf16.msra.mxu1 %v529_v31 }
 0x726   :  { %560 = vmatprep.subr.bf16.mxu1 %v532_v33 }
 0x729   :  { %561 = vmatpush1.bf16.msra.mxu1 %v531_v34 }
 0x773   :  { %v1490_v35 = vpop.permute.xlu0 %508 }
 0x77e   :  { %v513_v36 = vpop.permute.xlu0 %512 }
 0x77f   :  { %v515_v37 = vsel %vm98_vm0, %v1490_v35, %v513_v36 }
 0x780   :  { %v516_v38 = vpack.c.bf16 %v515_v37, %v515_v37 }
 0x782   :  { %579 = vmatmul.mubr.bf16.vlgmr.msra.gmra.mrb[4].mxu1 %v516_v38 }
 0x855   :  { %v580_v41 = vpop.f32.mrb[4].mxu1 }
 0x856   :  { %v582_v42 = vpop.f32.mrb[5].mxu1  ;;  %v581_v47 = vadd.f32 %v580_v41, %v539_v46 }
 0x857   :  { %v583_v43 = vadd.f32 %v582_v42, %v543_v40  ;;  %v584_v44 = vpop.f32.mrb[6].mxu1 }
 0x858   :  { %v585_v45 = vpop.f32.mrb[7].mxu1  ;;  %v1200_v48 = vmul.f32 -1.442695, %v581_v47 }
 0x859   :  { %594 = vrot.lane.b32.xlu1 %v583_v43, %s1303_s20 }
 0x85a   :  { %1254 = vpow2.f32 %v1200_v48 }
 0x864   :  { %v1255_v49 = vpop.eup %1254 }
 0x865   :  { %v590_v50 = vadd.f32 1.0, %v1255_v49 }
 0x867   :  { %1256 = vrcp.f32 %v590_v50 }
 0x871   :  { %v1257_v51 = vpop.eup %1256 }
 0x872   :  { %v600_v56 = vsub.f32 1.0, %v1257_v51  ;;  %v606_v58 = vmul.f32 %v1257_v51, %v513_v36 }
 0x8cb   :  { %v595_v52 = vpop.permute.xlu1 %594 }
 0x8cc   :  { %v597_v53 = vmul.f32 %v1257_v51, %v595_v52 }
 0x8ce   :  { %v598_v54 = vadd.f32 %v597_v53, %v583_v43 }
 0x8d0   :  { %1258 = vtanh.f32 %v598_v54 }
 0x8da   :  { %v1259_v55 = vpop.eup %1258 }
 0x8db   :  { %602 = vrot.lane.b32.xlu1 %v1259_v55, %s1303_s20 }
 0x94d   :  { %v603_v57 = vpop.permute.xlu1 %602 }
 0x94e   :  { %v605_v59 = vmul.f32 %v603_v57, %v600_v56 }
 0x950   :  { %v1501_v60 = vadd.f32 %v606_v58, %v605_v59 }
 0x951   :  { %1292 = dma.done.wait [#allocation3], 2048 }
 0x952   :  { %1293 = vsyncadd [#allocation3], 4294965248  ;;  %647 = vrot.lane.b32.xlu0 %v1501_v60, %s1303_s20  ;;  %717 = vmatprep.mubr.bf16.mxu0 %v1309_v1  ;;  %626 = sst [smem:[#allocation15]] %s1301_s18  ;;  %s610_s7 = scalar_lea.hbm %s1627_s1, 10240 }
 0x953   :  { %628 = sst [smem:[#allocation15 + $0x1]] %s1301_s18  ;;  %s1315_s8 = smov [#allocation14]  }
 0x954   :  { %630 = sst [smem:[#allocation15 + $0x2]] %s1302_s19 }
 0x955   :  { %632 = sst [smem:[#allocation15 + $0x3]] %s1303_s20 }
 0x956   :  { %634 = sst [smem:[#allocation15 + $0x4]] %s1304_s22 }
 0x957   :  { %636 = sst [smem:[#allocation15 + $0x5]] %s1302_s19 }
 0x958   :  { %638 = sst [smem:[#allocation15 + $0x6]] %s1304_s22 }
 0x959   :  { %640 = sst [smem:[#allocation15 + $0x7]] %s1303_s20 }
 0x95a   :  { %642 = sst [smem:[#allocation15 + $0x8]] %s1305_s24 }
 0x95b   :  { %644 = dma.general %s610_s7, 2048, %s1374_s6, %s1310_s0, %s1315_s8, [#allocation15], %s1351_s23, 0  }
 0x95c   :  { %v645_v61 = vld [vmem:[%s1629_s3 + $0x4] sm:$0x1]  ;;  %v657_v62 = vld [vmem:[#allocation2 + $0x8] sm:$0xff]  ;;  %v659_v0 = vld [vmem:[#allocation2 + $0x18] sm:$0xff] }
 0x95d   :  { %v656_v63 = vld [vmem:[#allocation2] sm:$0xff]  ;;  %651 = vrot.lane.b32.xlu0 %v645_v61, %s1303_s20  ;;  %685 = vmatprep.subr.bf16.mxu0 %v657_v62  ;;  %v658_v3 = vld [vmem:[#allocation2 + $0x10] sm:$0xff]  ;;  %v661_v4 = vld [vmem:[#allocation2 + $0x28] sm:$0xff] }
 0x95e   :  { %686 = vmatpush1.bf16.msra.mxu0 %v656_v63  ;;  %v660_v5 = vld [vmem:[#allocation2 + $0x20] sm:$0xff]  ;;  %v663_v6 = vld [vmem:[#allocation2 + $0x38] sm:$0xff]  ;;  %v662_v7 = vld [vmem:[#allocation2 + $0x30] sm:$0xff] }
 0x95f   :  { %687 = vmatprep.subr.bf16.mxu0 %v659_v0  ;;  %v665_v8 = vld [vmem:[#allocation2 + $0x48] sm:$0xff]  ;;  %v664_v9 = vld [vmem:[#allocation2 + $0x40] sm:$0xff]  ;;  %v667_v10 = vld [vmem:[#allocation2 + $0x58] sm:$0xff] }
 0x960   :  { %v666_v11 = vld [vmem:[#allocation2 + $0x50] sm:$0xff]  ;;  %v669_v12 = vld [vmem:[#allocation2 + $0x68] sm:$0xff]  ;;  %v668_v13 = vld [vmem:[#allocation2 + $0x60] sm:$0xff] }
 0x961   :  { %v671_v14 = vld [vmem:[#allocation2 + $0x78] sm:$0xff]  ;;  %v670_v15 = vld [vmem:[#allocation2 + $0x70] sm:$0xff]  ;;  %v1203_v20 = vld [vmem:[%s1628_s2 + $0x4] ss:$8 sm:$0x3] }
 0x962   :  { %688 = vmatpush1.bf16.msra.mxu0 %v658_v3  ;;  %v682_v21 = vrot.slane %v1203_v20, %v1393_v24  ;;  %v678_v31 = vrot.slane %v1203_v20, %v1401_v32 }
 0x963   :  { %689 = vmatprep.subr.bf16.mxu0 %v661_v4 }
 0x966   :  { %690 = vmatpush1.bf16.msra.mxu0 %v660_v5 }
 0x967   :  { %691 = vmatprep.subr.bf16.mxu0 %v663_v6 }
 0x96a   :  { %692 = vmatpush1.bf16.msra.mxu0 %v662_v7 }
 0x96b   :  { %693 = vmatprep.subr.bf16.mxu0 %v665_v8 }
 0x96e   :  { %694 = vmatpush1.bf16.msra.mxu0 %v664_v9 }
 0x96f   :  { %695 = vmatprep.subr.bf16.mxu0 %v667_v10 }
 0x972   :  { %696 = vmatpush1.bf16.msra.mxu0 %v666_v11 }
 0x973   :  { %697 = vmatprep.subr.bf16.mxu0 %v669_v12 }
 0x976   :  { %698 = vmatpush1.bf16.msra.mxu0 %v668_v13 }
 0x977   :  { %699 = vmatprep.subr.bf16.mxu0 %v671_v14 }
 0x97a   :  { %700 = vmatpush1.bf16.msra.mxu0 %v670_v15 }
 0x9c4   :  { %v648_v16 = vpop.permute.xlu0 %647 }
 0x9cf   :  { %v652_v17 = vpop.permute.xlu0 %651 }
 0x9d0   :  { %v654_v18 = vsel %vm98_vm0, %v648_v16, %v652_v17 }
 0x9d1   :  { %v655_v19 = vpack.c.bf16 %v654_v18, %v654_v18 }
 0x9d3   :  { %718 = vmatmul.mubr.bf16.vlgmr.msra.gmra.mrb[8].mxu0 %v655_v19 }
 0xaa6   :  { %v719_v25 = vpop.f32.mrb[8].mxu0 }
 0xaa7   :  { %v721_v26 = vpop.f32.mrb[9].mxu0  ;;  %v720_v33 = vadd.f32 %v719_v25, %v678_v31 }
 0xaa8   :  { %v722_v27 = vadd.f32 %v721_v26, %v682_v21  ;;  %v723_v28 = vpop.f32.mrb[10].mxu0 }
 0xaa9   :  { %v724_v29 = vpop.f32.mrb[11].mxu0  ;;  %v1204_v34 = vmul.f32 -1.442695, %v720_v33 }
 0xaaa   :  { %733 = vrot.lane.b32.xlu1 %v722_v27, %s1303_s20 }
 0xaab   :  { %1260 = vpow2.f32 %v1204_v34 }
 0xab5   :  { %v1261_v36 = vpop.eup %1260 }
 0xab6   :  { %v729_v37 = vadd.f32 1.0, %v1261_v36 }
 0xab8   :  { %1262 = vrcp.f32 %v729_v37 }
 0xac2   :  { %v1263_v38 = vpop.eup %1262 }
 0xac3   :  { %v739_v43 = vsub.f32 1.0, %v1263_v38  ;;  %v745_v45 = vmul.f32 %v1263_v38, %v652_v17 }
 0xb1c   :  { %v734_v39 = vpop.permute.xlu1 %733 }
 0xb1d   :  { %v736_v40 = vmul.f32 %v1263_v38, %v734_v39 }
 0xb1f   :  { %v737_v41 = vadd.f32 %v736_v40, %v722_v27 }
 0xb21   :  { %1264 = vtanh.f32 %v737_v41 }
 0xb2b   :  { %v1265_v42 = vpop.eup %1264 }
 0xb2c   :  { %741 = vrot.lane.b32.xlu1 %v1265_v42, %s1303_s20 }
 0xb9e   :  { %v742_v44 = vpop.permute.xlu1 %741 }
 0xb9f   :  { %v744_v46 = vmul.f32 %v742_v44, %v739_v43 }
 0xba1   :  { %v746_v47 = vadd.f32 %v745_v45, %v744_v46 }
 0xba2   :  { %1294 = dma.done.wait [#allocation3 + $0x1], 2048 }
 0xba3   :  { %1295 = vsyncadd [#allocation3 + $0x1], 4294965248  ;;  %786 = vrot.lane.b32.xlu0 %v746_v47, %s1303_s20  ;;  %856 = vmatprep.mubr.bf16.mxu1 %v1309_v1  ;;  %765 = sst [smem:[#allocation17]] %s1301_s18  ;;  %s749_s15 = scalar_lea.hbm %s1627_s1, 12288 }
 0xba4   :  { %767 = sst [smem:[#allocation17 + $0x1]] %s1301_s18  ;;  %s1316_s16 = smov [#allocation16]  }
 0xba5   :  { %769 = sst [smem:[#allocation17 + $0x2]] %s1302_s19 }
 0xba6   :  { %771 = sst [smem:[#allocation17 + $0x3]] %s1303_s20 }
 0xba7   :  { %773 = sst [smem:[#allocation17 + $0x4]] %s1304_s22 }
 0xba8   :  { %775 = sst [smem:[#allocation17 + $0x5]] %s1302_s19 }
 0xba9   :  { %777 = sst [smem:[#allocation17 + $0x6]] %s1304_s22 }
 0xbaa   :  { %779 = sst [smem:[#allocation17 + $0x7]] %s1303_s20 }
 0xbab   :  { %781 = sst [smem:[#allocation17 + $0x8]] %s1305_s24 }
 0xbac   :  { %783 = dma.general %s749_s15, 2048, %s1344_s17, %s1306_s25, %s1316_s16, [#allocation17], %s1351_s23, 0  }
 0xbad   :  { %v784_v48 = vld [vmem:[%s1629_s3 + $0x5] sm:$0x1]  ;;  %v796_v49 = vld [vmem:[#allocation2 + $0x88] sm:$0xff]  ;;  %v798_v51 = vld [vmem:[#allocation2 + $0x98] sm:$0xff] }
 0xbae   :  { %v795_v50 = vld [vmem:[#allocation2 + $0x80] sm:$0xff]  ;;  %790 = vrot.lane.b32.xlu0 %v784_v48, %s1303_s20  ;;  %824 = vmatprep.subr.bf16.mxu1 %v796_v49  ;;  %v797_v52 = vld [vmem:[#allocation2 + $0x90] sm:$0xff]  ;;  %v800_v53 = vld [vmem:[#allocation2 + $0xa8] sm:$0xff] }
 0xbaf   :  { %825 = vmatpush1.bf16.msra.mxu1 %v795_v50  ;;  %v799_v54 = vld [vmem:[#allocation2 + $0xa0] sm:$0xff]  ;;  %v802_v55 = vld [vmem:[#allocation2 + $0xb8] sm:$0xff]  ;;  %v801_v56 = vld [vmem:[#allocation2 + $0xb0] sm:$0xff] }
 0xbb0   :  { %826 = vmatprep.subr.bf16.mxu1 %v798_v51  ;;  %v804_v57 = vld [vmem:[#allocation2 + $0xc8] sm:$0xff]  ;;  %v803_v58 = vld [vmem:[#allocation2 + $0xc0] sm:$0xff]  ;;  %v806_v59 = vld [vmem:[#allocation2 + $0xd8] sm:$0xff] }
 0xbb1   :  { %v805_v61 = vld [vmem:[#allocation2 + $0xd0] sm:$0xff]  ;;  %v808_v62 = vld [vmem:[#allocation2 + $0xe8] sm:$0xff]  ;;  %v807_v63 = vld [vmem:[#allocation2 + $0xe0] sm:$0xff] }
 0xbb2   :  { %v810_v0 = vld [vmem:[#allocation2 + $0xf8] sm:$0xff]  ;;  %v809_v3 = vld [vmem:[#allocation2 + $0xf0] sm:$0xff]  ;;  %v1207_v8 = vld [vmem:[%s1628_s2 + $0x5] ss:$8 sm:$0x3] }
 0xbb3   :  { %827 = vmatpush1.bf16.msra.mxu1 %v797_v52  ;;  %v821_v9 = vrot.slane %v1207_v8, %v1393_v24  ;;  %v817_v15 = vrot.slane %v1207_v8, %v1401_v32 }
 0xbb4   :  { %828 = vmatprep.subr.bf16.mxu1 %v800_v53 }
 0xbb7   :  { %829 = vmatpush1.bf16.msra.mxu1 %v799_v54 }
 0xbb8   :  { %830 = vmatprep.subr.bf16.mxu1 %v802_v55 }
 0xbbb   :  { %831 = vmatpush1.bf16.msra.mxu1 %v801_v56 }
 0xbbc   :  { %832 = vmatprep.subr.bf16.mxu1 %v804_v57 }
 0xbbf   :  { %833 = vmatpush1.bf16.msra.mxu1 %v803_v58 }
 0xbc0   :  { %834 = vmatprep.subr.bf16.mxu1 %v806_v59 }
 0xbc3   :  { %835 = vmatpush1.bf16.msra.mxu1 %v805_v61 }
 0xbc4   :  { %836 = vmatprep.subr.bf16.mxu1 %v808_v62 }
 0xbc7   :  { %837 = vmatpush1.bf16.msra.mxu1 %v807_v63 }
 0xbc8   :  { %838 = vmatprep.subr.bf16.mxu1 %v810_v0 }
 0xbcb   :  { %839 = vmatpush1.bf16.msra.mxu1 %v809_v3 }
 0xc15   :  { %v1554_v4 = vpop.permute.xlu0 %786 }
 0xc20   :  { %v791_v5 = vpop.permute.xlu0 %790 }
 0xc21   :  { %v793_v6 = vsel %vm98_vm0, %v1554_v4, %v791_v5 }
 0xc22   :  { %v794_v7 = vpack.c.bf16 %v793_v6, %v793_v6 }
 0xc24   :  { %857 = vmatmul.mubr.bf16.vlgmr.msra.gmra.mrb[8].mxu1 %v794_v7 }
 0xcf7   :  { %v858_v10 = vpop.f32.mrb[8].mxu1 }
 0xcf8   :  { %v860_v11 = vpop.f32.mrb[9].mxu1  ;;  %v859_v16 = vadd.f32 %v858_v10, %v817_v15 }
 0xcf9   :  { %v861_v12 = vadd.f32 %v860_v11, %v821_v9  ;;  %v862_v13 = vpop.f32.mrb[10].mxu1 }
 0xcfa   :  { %v863_v14 = vpop.f32.mrb[11].mxu1  ;;  %v1208_v17 = vmul.f32 -1.442695, %v859_v16 }
 0xcfb   :  { %872 = vrot.lane.b32.xlu1 %v861_v12, %s1303_s20 }
 0xcfc   :  { %1266 = vpow2.f32 %v1208_v17 }
 0xd06   :  { %v1267_v18 = vpop.eup %1266 }
 0xd07   :  { %v868_v19 = vadd.f32 1.0, %v1267_v18 }
 0xd09   :  { %1268 = vrcp.f32 %v868_v19 }
 0xd13   :  { %v1269_v20 = vpop.eup %1268 }
 0xd14   :  { %v878_v28 = vsub.f32 1.0, %v1269_v20  ;;  %v884_v31 = vmul.f32 %v1269_v20, %v791_v5 }
 0xd6d   :  { %v873_v21 = vpop.permute.xlu1 %872 }
 0xd6e   :  { %v875_v25 = vmul.f32 %v1269_v20, %v873_v21 }
 0xd70   :  { %v876_v26 = vadd.f32 %v875_v25, %v861_v12 }
 0xd72   :  { %1270 = vtanh.f32 %v876_v26 }
 0xd7c   :  { %v1271_v27 = vpop.eup %1270 }
 0xd7d   :  { %880 = vrot.lane.b32.xlu1 %v1271_v27, %s1303_s20 }
 0xdef   :  { %v881_v29 = vpop.permute.xlu1 %880 }
 0xdf0   :  { %v883_v33 = vmul.f32 %v881_v29, %v878_v28 }
 0xdf2   :  { %v1565_v34 = vadd.f32 %v884_v31, %v883_v33 }
 0xdf3   :  { %1296 = dma.done.wait [#allocation3], 2048 }
 0xdf4   :  { %1297 = vsyncadd [#allocation3], 4294965248  ;;  %925 = vrot.lane.b32.xlu0 %v1565_v34, %s1303_s20  ;;  %995 = vmatprep.mubr.bf16.mxu0 %v1309_v1  ;;  %904 = sst [smem:[#allocation19]] %s1301_s18  ;;  %s888_s29 = scalar_lea.hbm %s1627_s1, 14336 }
 0xdf5   :  { %906 = sst [smem:[#allocation19 + $0x1]] %s1301_s18  ;;  %s1317_s30 = smov [#allocation18]  }
 0xdf6   :  { %908 = sst [smem:[#allocation19 + $0x2]] %s1302_s19 }
 0xdf7   :  { %910 = sst [smem:[#allocation19 + $0x3]] %s1303_s20 }
 0xdf8   :  { %912 = sst [smem:[#allocation19 + $0x4]] %s1304_s22 }
 0xdf9   :  { %914 = sst [smem:[#allocation19 + $0x5]] %s1302_s19 }
 0xdfa   :  { %916 = sst [smem:[#allocation19 + $0x6]] %s1304_s22 }
 0xdfb   :  { %918 = sst [smem:[#allocation19 + $0x7]] %s1303_s20 }
 0xdfc   :  { %920 = sst [smem:[#allocation19 + $0x8]] %s1305_s24 }
 0xdfd   :  { %922 = dma.general %s888_s29, 2048, %s1374_s6, %s1310_s0, %s1317_s30, [#allocation19], %s1351_s23, 0  }
 0xdfe   :  { %v923_v36 = vld [vmem:[%s1629_s3 + $0x6] sm:$0x1]  ;;  %v935_v37 = vld [vmem:[#allocation2 + $0x8] sm:$0xff]  ;;  %v937_v39 = vld [vmem:[#allocation2 + $0x18] sm:$0xff] }
 0xdff   :  { %v934_v38 = vld [vmem:[#allocation2] sm:$0xff]  ;;  %929 = vrot.lane.b32.xlu0 %v923_v36, %s1303_s20  ;;  %963 = vmatprep.subr.bf16.mxu0 %v935_v37  ;;  %v936_v40 = vld [vmem:[#allocation2 + $0x10] sm:$0xff]  ;;  %v939_v41 = vld [vmem:[#allocation2 + $0x28] sm:$0xff] }
 0xe00   :  { %964 = vmatpush1.bf16.msra.mxu0 %v934_v38  ;;  %v938_v42 = vld [vmem:[#allocation2 + $0x20] sm:$0xff]  ;;  %v941_v43 = vld [vmem:[#allocation2 + $0x38] sm:$0xff]  ;;  %v940_v44 = vld [vmem:[#allocation2 + $0x30] sm:$0xff] }
 0xe01   :  { %965 = vmatprep.subr.bf16.mxu0 %v937_v39  ;;  %v943_v45 = vld [vmem:[#allocation2 + $0x48] sm:$0xff]  ;;  %v942_v46 = vld [vmem:[#allocation2 + $0x40] sm:$0xff]  ;;  %v945_v47 = vld [vmem:[#allocation2 + $0x58] sm:$0xff] }
 0xe02   :  { %v944_v48 = vld [vmem:[#allocation2 + $0x50] sm:$0xff]  ;;  %v947_v49 = vld [vmem:[#allocation2 + $0x68] sm:$0xff]  ;;  %v946_v50 = vld [vmem:[#allocation2 + $0x60] sm:$0xff] }
 0xe03   :  { %v949_v51 = vld [vmem:[#allocation2 + $0x78] sm:$0xff]  ;;  %v948_v52 = vld [vmem:[#allocation2 + $0x70] sm:$0xff]  ;;  %v1211_v57 = vld [vmem:[%s1628_s2 + $0x6] ss:$8 sm:$0x3] }
 0xe04   :  { %966 = vmatpush1.bf16.msra.mxu0 %v936_v40  ;;  %v960_v58 = vrot.slane %v1211_v57, %v1393_v24  ;;  %v956_v3 = vrot.slane %v1211_v57, %v1401_v32 }
 0xe05   :  { %967 = vmatprep.subr.bf16.mxu0 %v939_v41 }
 0xe08   :  { %968 = vmatpush1.bf16.msra.mxu0 %v938_v42 }
 0xe09   :  { %969 = vmatprep.subr.bf16.mxu0 %v941_v43 }
 0xe0c   :  { %970 = vmatpush1.bf16.msra.mxu0 %v940_v44 }
 0xe0d   :  { %971 = vmatprep.subr.bf16.mxu0 %v943_v45 }
 0xe10   :  { %972 = vmatpush1.bf16.msra.mxu0 %v942_v46 }
 0xe11   :  { %973 = vmatprep.subr.bf16.mxu0 %v945_v47 }
 0xe14   :  { %974 = vmatpush1.bf16.msra.mxu0 %v944_v48 }
 0xe15   :  { %975 = vmatprep.subr.bf16.mxu0 %v947_v49 }
 0xe18   :  { %976 = vmatpush1.bf16.msra.mxu0 %v946_v50 }
 0xe19   :  { %977 = vmatprep.subr.bf16.mxu0 %v949_v51 }
 0xe1c   :  { %978 = vmatpush1.bf16.msra.mxu0 %v948_v52 }
 0xe66   :  { %v926_v53 = vpop.permute.xlu0 %925 }
 0xe71   :  { %v930_v54 = vpop.permute.xlu0 %929 }
 0xe72   :  { %v932_v55 = vsel %vm98_vm0, %v926_v53, %v930_v54 }
 0xe73   :  { %v933_v56 = vpack.c.bf16 %v932_v55, %v932_v55 }
 0xe75   :  { %996 = vmatmul.mubr.bf16.vlgmr.msra.gmra.mrb[12].mxu0 %v933_v56 }
 0xf48   :  { %v997_v59 = vpop.f32.mrb[12].mxu0 }
 0xf49   :  { %v999_v61 = vpop.f32.mrb[13].mxu0  ;;  %v998_v5 = vadd.f32 %v997_v59, %v956_v3 }
 0xf4a   :  { %v1000_v62 = vadd.f32 %v999_v61, %v960_v58  ;;  %v1001_v63 = vpop.f32.mrb[14].mxu0 }
 0xf4b   :  { %v1002_v0 = vpop.f32.mrb[15].mxu0  ;;  %v1212_v6 = vmul.f32 -1.442695, %v998_v5 }
 0xf4c   :  { %1011 = vrot.lane.b32.xlu1 %v1000_v62, %s1303_s20 }
 0xf4d   :  { %1272 = vpow2.f32 %v1212_v6 }
 0xf57   :  { %v1273_v7 = vpop.eup %1272 }
 0xf58   :  { %v1007_v8 = vadd.f32 1.0, %v1273_v7 }
 0xf5a   :  { %1274 = vrcp.f32 %v1007_v8 }
 0xf64   :  { %v1275_v9 = vpop.eup %1274 }
 0xf65   :  { %v1017_v14 = vsub.f32 1.0, %v1275_v9  ;;  %v1023_v16 = vmul.f32 %v1275_v9, %v930_v54 }
 0xfbe   :  { %v1012_v10 = vpop.permute.xlu1 %1011 }
 0xfbf   :  { %v1014_v11 = vmul.f32 %v1275_v9, %v1012_v10 }
 0xfc1   :  { %v1015_v12 = vadd.f32 %v1014_v11, %v1000_v62 }
 0xfc3   :  { %1276 = vtanh.f32 %v1015_v12 }
 0xfcd   :  { %v1277_v13 = vpop.eup %1276 }
 0xfce   :  { %1019 = vrot.lane.b32.xlu1 %v1277_v13, %s1303_s20 }
0x1040   :  { %v1020_v15 = vpop.permute.xlu1 %1019 }
0x1041   :  { %v1022_v17 = vmul.f32 %v1020_v15, %v1017_v14 }
0x1043   :  { %v1024_v18 = vadd.f32 %v1023_v16, %v1022_v17 }
0x1044   :  { %1298 = dma.done.wait [#allocation3 + $0x1], 2048 }
0x1045   :  { %1299 = vsyncadd [#allocation3 + $0x1], 4294965248  ;;  %1029 = vrot.lane.b32.xlu0 %v1024_v18, %s1303_s20  ;;  %1099 = vmatprep.mubr.bf16.mxu1 %v1309_v1  ;;  %v1027_v19 = vld [vmem:[%s1629_s3 + $0x7] sm:$0x1]  ;;  %v1039_v20 = vld [vmem:[#allocation2 + $0x88] sm:$0xff]  ;;  %v1130_v6 = vsel %vm98_vm0, %v1490_v35, %v1501_v60  ;;  %v1131_v12 = vsel %vm98_vm0, %v1554_v4, %v1565_v34  ;;  %vm1164_vm1 = vcmp.lt.s32.totalorder %v119_v22, 512 }
0x1046   :  { %v1038_v21 = vld [vmem:[#allocation2 + $0x80] sm:$0xff]  ;;  %1067 = vmatprep.subr.bf16.mxu1 %v1039_v20  ;;  %v1041_v25 = vld [vmem:[#allocation2 + $0x98] sm:$0xff]  ;;  %v1040_v26 = vld [vmem:[#allocation2 + $0x90] sm:$0xff]  ;;  %v1318_v63 = vmov 1966171168  }
0x1047   :  { %1068 = vmatpush1.bf16.msra.mxu1 %v1038_v21  ;;  %v1043_v27 = vld [vmem:[#allocation2 + $0xa8] sm:$0xff]  ;;  %v1042_v28 = vld [vmem:[#allocation2 + $0xa0] sm:$0xff]  ;;  %v1045_v29 = vld [vmem:[#allocation2 + $0xb8] sm:$0xff]  ;;  %v1140_v0 = vunpack.c.l.s4 %v1318_v63 }
0x1048   :  { %1069 = vmatprep.subr.bf16.mxu1 %v1041_v25  ;;  %v1044_v1 = vld [vmem:[#allocation2 + $0xb0] sm:$0xff]  ;;  %v1047_v31 = vld [vmem:[#allocation2 + $0xc8] sm:$0xff]  ;;  %v1046_v33 = vld [vmem:[#allocation2 + $0xc0] sm:$0xff] }
0x1049   :  { %1033 = vrot.lane.b32.xlu0 %v1027_v19, %s1303_s20  ;;  %v1049_v36 = vld [vmem:[#allocation2 + $0xd8] sm:$0xff]  ;;  %v1048_v37 = vld [vmem:[#allocation2 + $0xd0] sm:$0xff]  ;;  %v1051_v38 = vld [vmem:[#allocation2 + $0xe8] sm:$0xff]  ;;  %v1141_v3 = vunpack.c.0.s8 %v1140_v0 }
0x104a   :  { %v1050_v39 = vld [vmem:[#allocation2 + $0xe0] sm:$0xff]  ;;  %v1053_v40 = vld [vmem:[#allocation2 + $0xf8] sm:$0xff]  ;;  %v1052_v41 = vld [vmem:[#allocation2 + $0xf0] sm:$0xff] }
0x104b   :  { %1070 = vmatpush1.bf16.msra.mxu1 %v1040_v26  ;;  %v1213_v46 = vld [vmem:[%s1628_s2 + $0x7] ss:$8 sm:$0x3]  ;;  %v1144_v11 = vsub.s32 %v1141_v3, %v1390_v23 }
0x104c   :  { %1071 = vmatprep.subr.bf16.mxu1 %v1043_v27  ;;  %v1064_v47 = vrot.slane %v1213_v46, %v1393_v24  ;;  %v1060_v53 = vrot.slane %v1213_v46, %v1401_v32  ;;  %v1129_v32 = vsel %vm98_vm0, %v1426_v2, %v1437_v30 }
0x104d   :  { %v1137_v10 = vcombine.low %v1129_v32, %v1130_v6 }
0x104f   :  { %1072 = vmatpush1.bf16.msra.mxu1 %v1042_v28  ;;  %v1145_v15 = vrot.slane %v1137_v10, %v1144_v11 }
0x1050   :  { %1073 = vmatprep.subr.bf16.mxu1 %v1045_v29 }
0x1053   :  { %1074 = vmatpush1.bf16.msra.mxu1 %v1044_v1 }
0x1054   :  { %1075 = vmatprep.subr.bf16.mxu1 %v1047_v31 }
0x1057   :  { %1076 = vmatpush1.bf16.msra.mxu1 %v1046_v33 }
0x1058   :  { %1077 = vmatprep.subr.bf16.mxu1 %v1049_v36 }
0x105b   :  { %1078 = vmatpush1.bf16.msra.mxu1 %v1048_v37 }
0x105c   :  { %1079 = vmatprep.subr.bf16.mxu1 %v1051_v38 }
0x105f   :  { %1080 = vmatpush1.bf16.msra.mxu1 %v1050_v39 }
0x1060   :  { %1081 = vmatprep.subr.bf16.mxu1 %v1053_v40 }
0x1063   :  { %1082 = vmatpush1.bf16.msra.mxu1 %v1052_v41 }
0x10b7   :  { %v1030_v42 = vpop.permute.xlu0 %1029 }
0x10bb   :  { %v1034_v43 = vpop.permute.xlu0 %1033 }
0x10bc   :  { %v1036_v44 = vsel %vm98_vm0, %v1030_v42, %v1034_v43 }
0x10bd   :  { %v1037_v45 = vpack.c.bf16 %v1036_v44, %v1036_v44 }
0x10bf   :  { %1100 = vmatmul.mubr.bf16.vlgmr.msra.gmra.mrb[12].mxu1 %v1037_v45 }
0x1192   :  { %v1101_v48 = vpop.f32.mrb[12].mxu1 }
0x1193   :  { %v1103_v49 = vpop.f32.mrb[13].mxu1  ;;  %v1102_v54 = vadd.f32 %v1101_v48, %v1060_v53 }
0x1194   :  { %v1104_v50 = vadd.f32 %v1103_v49, %v1064_v47  ;;  %v1105_v51 = vpop.f32.mrb[14].mxu1 }
0x1195   :  { %v1106_v52 = vpop.f32.mrb[15].mxu1  ;;  %v1214_v55 = vmul.f32 -1.442695, %v1102_v54 }
0x1196   :  { %1115 = vrot.lane.b32.xlu1 %v1104_v50, %s1303_s20 }
0x1197   :  { %1278 = vpow2.f32 %v1214_v55 }
0x11a1   :  { %v1279_v56 = vpop.eup %1278 }
0x11a2   :  { %v1111_v57 = vadd.f32 1.0, %v1279_v56 }
0x11a4   :  { %1280 = vrcp.f32 %v1111_v57 }
0x11ae   :  { %v1281_v58 = vpop.eup %1280 }
0x11af   :  { %v1121_v5 = vsub.f32 1.0, %v1281_v58  ;;  %v1127_v8 = vmul.f32 %v1281_v58, %v1034_v43 }
0x1208   :  { %v1116_v59 = vpop.permute.xlu1 %1115 }
0x1209   :  { %v1118_v61 = vmul.f32 %v1281_v58, %v1116_v59 }
0x120b   :  { %v1119_v62 = vadd.f32 %v1118_v61, %v1104_v50 }
0x120d   :  { %1282 = vtanh.f32 %v1119_v62 }
0x1217   :  { %v1283_v24 = vpop.eup %1282 }
0x1218   :  { %1123 = vrot.lane.b32.xlu1 %v1283_v24, %s1303_s20 }
0x128a   :  { %v1124_v7 = vpop.permute.xlu1 %1123 }
0x128b   :  { %v1126_v9 = vmul.f32 %v1124_v7, %v1121_v5 }
0x128d   :  { %v1128_v13 = vadd.f32 %v1127_v8, %v1126_v9 }
0x128f   :  { %v1132_v14 = vsel %vm98_vm0, %v1030_v42, %v1128_v13 }
0x1290   :  { %v1138_v16 = vcombine.low %v1131_v12, %v1132_v14 }
0x1292   :  { %v1152_v2 = vrot.slane %v1138_v16, %v1144_v11 }
0x1294   :  { %v1153_v30 = vcombine.low %v1145_v15, %v1152_v2 }
0x1296   :  { %v1160_v35 = vrot.slane %v1153_v30, %v1144_v11 }
0x1298   :  { %1166 = vst.msk [vmem:[%s1630_s4] sm:$0xf] %vm1164_vm1, %v1160_v35 }
0x1299   :  { %1171 = vsyncmov [#allocation3] }
0x129c   :  { %s1172_s6 = vpop.sfrf %1171 }
0x129d   :  { %p1215_p0 = scmp.ne.s32.totalorder %s1172_s6, 0 }
0x129f   :  { %1176 = shalt.err (%p1215_p0)  }
0x12a0   :  { %1178 = vsyncmov [#allocation3 + $0x1] }
0x12a3   :  { %s1179_s0 = vpop.sfrf %1178 }
0x12a4   :  { %p1216_p1 = scmp.ne.s32.totalorder %s1179_s0, 0 }
0x12a6   :  { %1183 = shalt.err (%p1216_p1)  }

</bundles_post_ra>
